<compile_context>
chip_gen: v7x
topology: tpu7x:2x2x1
jax: 0.10.0
libtpu: 0.0.40
codegen_flags: <defaults>
</compile_context>

<pallas_src>
import functools

import jax
import jax.numpy as jnp
from jax import lax
from jax.experimental import pallas as pl
from jax.experimental.pallas import tpu as pltpu


def _mod(a, m):
    # a % m, as a bitwise-and when m is a power of two (cheaper on the VPU).
    if m & (m - 1) == 0:
        return jnp.bitwise_and(a, m - 1)
    return a % m


# ------------- 3x3 "same" conv on channel-major, batch-folded activations -------------
def _conv3x3_lanes(x, w_stack, H, W, c_out):
    """x: (c_in, L) f32 with lane = n*H*W + h*W + w (batch folded into lanes).
    w_stack: (9*c_out, c_in), row t*c_out + co = w[t, :, co], tap t = ky*3 + kx.
    Returns (c_out, L) f32."""
    HW = H * W
    L = x.shape[1]
    # One wide MXU push: all 9 taps stacked along the sublane (M) axis.
    q = jnp.dot(w_stack, x, preferred_element_type=jnp.float32)        # (9*c_out, L)

    lane = lax.broadcasted_iota(jnp.int32, (c_out, L), 1)
    pix = _mod(lane, HW)     # within-image pixel index -> no cross-image leakage
    col = _mod(lane, W)      # within-row column (W | HW so lane % W == pix % W)

    acc = jnp.zeros((c_out, L), jnp.float32)
    for t in range(9):
        dy, dx = t // 3 - 1, t % 3 - 1
        qt = q[t * c_out:(t + 1) * c_out, :]          # sublane-aligned slice (c_out = 8)
        s = dy * W + dx
        if s != 0:
            qt = pltpu.roll(qt, shift=(-s) % L, axis=1)   # qt[:, i] = Q_t[:, i + s]
        conds = []
        if dy < 0:
            conds.append(pix >= -dy * W)          # row + dy >= 0
        if dy > 0:
            conds.append(pix < HW - dy * W)       # row + dy < H
        if dx < 0:
            conds.append(col >= -dx)              # col + dx >= 0
        if dx > 0:
            conds.append(col < W - dx)            # col + dx < W
        if conds:
            valid = functools.reduce(lambda a, b: a & b, conds)
            qt = jnp.where(valid, qt, 0.0)
        acc = acc + qt
    return acc


# ------------------------- in-kernel BatchNorm (batch stats) + ReLU -------------------------
def _bn_relu(y, gamma, beta, count, eps):
    s = jnp.sum(y, axis=1, keepdims=True)                  # (C, 1) channel sums (XLU)
    q = jnp.sum(y * y, axis=1, keepdims=True)
    mean = s * (1.0 / count)
    # TODO(synk): E[x^2]-mean^2 can cancel for large activation means; fine for this init.
    var = q * (1.0 / count) - mean * mean
    scale = gamma * lax.rsqrt(var + eps)                   # EUP
    bias = beta - mean * scale
    return jnp.maximum(y * scale + bias, 0.0)


# ------------------------------------ single fused kernel ------------------------------------
def _upconv_fused_kernel(x_ref, w1_ref, w2_ref, wu_ref,
                         g1_ref, b1_ref, g2_ref, b2_ref, bu_ref,
                         o_ref, *, H, W, c2, eps):
    L = x_ref.shape[-1]                                    # N * H * W
    count = float(L)

    x = x_ref[...].astype(jnp.float32)                     # (cin, L)
    y1 = _conv3x3_lanes(x, w1_ref[...], H, W, c2)          # (c2, L)
    a1 = _bn_relu(y1, g1_ref[...], b1_ref[...], count, eps)
    y2 = _conv3x3_lanes(a1, w2_ref[...], H, W, c2)         # (c2, L)
    a2 = _bn_relu(y2, g2_ref[...], b2_ref[...], count, eps)

    # ConvTranspose2d(k=2, s=2): one (4*co, c2) x (c2, L) dot; row k*co+f is the
    # (dy, dx) = (k//2, k%2) sub-pixel plane of output channel f.
    up = jnp.dot(wu_ref[...], a2, preferred_element_type=jnp.float32) + bu_ref[...]
    o_ref[...] = up.astype(o_ref.dtype)                    # lane-dense (4*co, L) store


def _full_spec(shape):
    return pl.BlockSpec(shape, lambda i: (0,) * len(shape))


def upconv_fused(x_flat, w1s, w2s, wus, g1, b1, g2, b2, bus, H, W, eps):
    c_in, L = x_flat.shape
    c2 = w1s.shape[0] // 9
    c4 = wus.shape[0]
    return pl.pallas_call(
        functools.partial(_upconv_fused_kernel, H=H, W=W, c2=c2, eps=eps),
        out_shape=jax.ShapeDtypeStruct((c4, L), jnp.float32),
        grid=(1,),
        in_specs=[_full_spec((c_in, L)),
                  _full_spec((9 * c2, c_in)),
                  _full_spec((9 * c2, c2)),
                  _full_spec((c4, c2)),
                  _full_spec((c2, 1)), _full_spec((c2, 1)),
                  _full_spec((c2, 1)), _full_spec((c2, 1)),
                  _full_spec((c4, 1))],
        out_specs=_full_spec((c4, L)),
        compiler_params=pltpu.CompilerParams(dimension_semantics=("arbitrary",)),
    )(x_flat, w1s, w2s, wus, g1, b1, g2, b2, bus)


# ----------------------------------------- full forward -----------------------------------------
def upconv_forward(x_nchw, p, eps=1e-5):
    N, c_in, H, W = x_nchw.shape
    HW = H * W
    c2 = p['w1'].shape[-1]                                   # 2 * cout
    co = p['wu'].shape[-1]                                   # cout

    # Channel-major with the batch folded into lanes: lane = n*H*W + h*W + w.
    x_flat = jnp.transpose(x_nchw, (1, 0, 2, 3)).reshape(c_in, N * HW)   # tiny 8 KB transpose

    # Stack conv taps along the output-channel (M) axis: row t*C+co = w[t, :, co].
    w1s = p['w1'].transpose(0, 2, 1).reshape(9 * c2, c_in)
    w2s = p['w2'].transpose(0, 2, 1).reshape(9 * c2, c2)
    wus = p['wu'].transpose(0, 2, 1).reshape(4 * co, c2)     # row k*co+f = wu[k, :, f], k=dy*2+dx
    bus = jnp.tile(p['bu'], 4).reshape(4 * co, 1)

    up = upconv_fused(x_flat, w1s, w2s, wus,
                      p['g1'].reshape(-1, 1), p['b1'].reshape(-1, 1),
                      p['g2'].reshape(-1, 1), p['b2'].reshape(-1, 1),
                      bus, H, W, eps)                        # (4*co, N*HW)

    # TODO(synk): sub-pixel interleave + NCHW assembly (32 KB) is the only XLA
    # rearrangement left; an in-kernel strided-store epilogue could remove it
    # but is not worth the lowering risk at this size.
    out = up.reshape(2, 2, co, N, H, W).transpose(3, 2, 4, 0, 5, 1)   # (N, co, H, dy, W, dx)
    return out.reshape(N, co, 2 * H, 2 * W)


# ----------------------------- deterministic parameter init -----------------------------
def init_params(key, cin, cout):
    c2 = 2 * cout
    k0, k1, k2, k3 = jax.random.split(key, 4)
    return dict(
        w1=0.1 * jax.random.normal(k0, (9, cin, c2), jnp.float32),   # conv1 taps (ky*3+kx, ci, co)
        w2=0.1 * jax.random.normal(k1, (9, c2, c2), jnp.float32),    # conv2 taps
        wu=0.1 * jax.random.normal(k2, (4, c2, cout), jnp.float32),  # upconv taps (dy*2+dx, ci, co)
        bu=0.1 * jax.random.normal(k3, (cout,), jnp.float32),        # upconv bias
        g1=jnp.ones((c2,), jnp.float32), b1=jnp.zeros((c2,), jnp.float32),
        g2=jnp.ones((c2,), jnp.float32), b2=jnp.zeros((c2,), jnp.float32),
    )


# ----------------------------- plain-JAX reference for checking -----------------------------
def reference_forward(x_nchw, p, eps=1e-5):
    x = jnp.transpose(x_nchw, (0, 2, 3, 1))

    def conv(a, w9):
        N, H, W, _ = a.shape
        ap = jnp.pad(a, ((0, 0), (1, 1), (1, 1), (0, 0)))
        y = 0.0
        for t in range(9):
            ky, kx = t // 3, t % 3
            y = y + jnp.einsum('nhwc,cf->nhwf', ap[:, ky:ky + H, kx:kx + W, :], w9[t])
        return y

    def bnr(y, g, b):
        m = jnp.mean(y, axis=(0, 1, 2))
        v = jnp.mean((y - m) ** 2, axis=(0, 1, 2))
        return jnp.maximum((y - m) * jax.lax.rsqrt(v + eps) * g + b, 0.0)

    a1 = bnr(conv(x, p['w1']), p['g1'], p['b1'])
    a2 = bnr(conv(a1, p['w2']), p['g2'], p['b2'])
    N, H, W, _ = a2.shape
    Co = p['wu'].shape[-1]
    t = jnp.einsum('nhwc,kcf->nhwkf', a2, p['wu'])               # (N,H,W,4,Co)
    t = t.reshape(N, H, W, 2, 2, Co).transpose(0, 1, 3, 2, 4, 5)
    t = t.reshape(N, 2 * H, 2 * W, Co) + p['bu']
    return jnp.transpose(t, (0, 3, 1, 2))


if __name__ == "__main__":
    key = jax.random.PRNGKey(0)
    kx, kp = jax.random.split(key)
    cin, cout = 4, 4
    x = jax.random.normal(kx, (2, cin, 16, 16), jnp.float32)     # NCHW like PyTorch
    params = init_params(kp, cin, cout)

    fwd = jax.jit(upconv_forward)
    out = jax.block_until_ready(fwd(x, params))
    ref = reference_forward(x, params)

    assert out.shape == (2, cout, 32, 32), out.shape
    err = float(jnp.max(jnp.abs(out - ref)))
    assert jnp.allclose(out, ref, atol=1e-3, rtol=1e-3), err
    print("KERNEL_OK")
</pallas_src>

<mosaic_0001>
module attributes {stable_mosaic.version = 11 : i64} {
  func.func @_upconv_fused_kernel(%arg0: i32, %arg1: memref<4x512xf32, #tpu.memory_space<vmem>>, %arg2: memref<72x4xf32, #tpu.memory_space<vmem>>, %arg3: memref<72x8xf32, #tpu.memory_space<vmem>>, %arg4: memref<16x8xf32, #tpu.memory_space<vmem>>, %arg5: memref<8x1xf32, #tpu.memory_space<vmem>>, %arg6: memref<8x1xf32, #tpu.memory_space<vmem>>, %arg7: memref<8x1xf32, #tpu.memory_space<vmem>>, %arg8: memref<8x1xf32, #tpu.memory_space<vmem>>, %arg9: memref<16x1xf32, #tpu.memory_space<vmem>>, %arg10: memref<16x512xf32, #tpu.memory_space<vmem>>) attributes {dimension_semantics = [#tpu.dimension_semantics<arbitrary>], iteration_bounds = array<i64: 1>, scalar_prefetch = 0 : i64, scratch_operands = 0 : i64, tpu.core_type = #tpu.core_type<tc>, window_params = [{pipeline_mode = #tpu.pipeline_mode<synchronous>, transform_indices = @transform_0, window_bounds = array<i64: 4, 512>}, {pipeline_mode = #tpu.pipeline_mode<synchronous>, transform_indices = @transform_1, window_bounds = array<i64: 72, 4>}, {pipeline_mode = #tpu.pipeline_mode<synchronous>, transform_indices = @transform_2, window_bounds = array<i64: 72, 8>}, {pipeline_mode = #tpu.pipeline_mode<synchronous>, transform_indices = @transform_3, window_bounds = array<i64: 16, 8>}, {pipeline_mode = #tpu.pipeline_mode<synchronous>, transform_indices = @transform_4, window_bounds = array<i64: 8, 1>}, {pipeline_mode = #tpu.pipeline_mode<synchronous>, transform_indices = @transform_5, window_bounds = array<i64: 8, 1>}, {pipeline_mode = #tpu.pipeline_mode<synchronous>, transform_indices = @transform_6, window_bounds = array<i64: 8, 1>}, {pipeline_mode = #tpu.pipeline_mode<synchronous>, transform_indices = @transform_7, window_bounds = array<i64: 8, 1>}, {pipeline_mode = #tpu.pipeline_mode<synchronous>, transform_indices = @transform_8, window_bounds = array<i64: 16, 1>}, {pipeline_mode = #tpu.pipeline_mode<synchronous>, transform_indices = @transform_9, window_bounds = array<i64: 16, 512>}]} {
    %c0 = arith.constant 0 : index
    %c0_0 = arith.constant 0 : index
    %0 = vector.load %arg1[%c0, %c0_0] : memref<4x512xf32, #tpu.memory_space<vmem>>, vector<4x512xf32>
    %c0_1 = arith.constant 0 : index
    %c0_2 = arith.constant 0 : index
    %1 = vector.load %arg2[%c0_1, %c0_2] : memref<72x4xf32, #tpu.memory_space<vmem>>, vector<72x4xf32>
    %cst = arith.constant dense<0.000000e+00> : vector<72x512xf32>
    %2 = tpu.matmul %1, %0, %cst {dimension_numbers = #tpu.dot_dimension_numbers<[1], [0], [0], [1], [0, 0, 1, 1], [], []>} : vector<72x4xf32>, vector<4x512xf32>, vector<72x512xf32> -> vector<72x512xf32>
    %3 = tpu.iota {dimensions = array<i32: 1>} : vector<8x512xi32>
    %c255_i32 = arith.constant 255 : i32
    %4 = vector.broadcast %c255_i32 : i32 to vector<8x512xi32>
    %5 = arith.andi %3, %4 : vector<8x512xi32>
    %c15_i32 = arith.constant 15 : i32
    %6 = vector.broadcast %c15_i32 : i32 to vector<8x512xi32>
    %7 = arith.andi %3, %6 : vector<8x512xi32>
    %cst_3 = arith.constant 0.000000e+00 : f32
    %8 = vector.broadcast %cst_3 : f32 to vector<8x512xf32>
    %9 = vector.extract_strided_slice %2 {offsets = [0, 0], sizes = [8, 512], strides = [1, 1]} : vector<72x512xf32> to vector<8x512xf32>
    %c17_i32 = arith.constant 17 : i32
    %10 = tpu.dynamic_rotate %9 by %c17_i32 dim 1 : vector<8x512xf32>, i32 -> vector<8x512xf32>
    %c16_i32 = arith.constant 16 : i32
    %11 = vector.broadcast %c16_i32 : i32 to vector<8x512xi32>
    %12 = arith.cmpi sge, %5, %11 : vector<8x512xi32>
    %c1_i32 = arith.constant 1 : i32
    %13 = vector.broadcast %c1_i32 : i32 to vector<8x512xi32>
    %14 = arith.cmpi sge, %7, %13 : vector<8x512xi32>
    %15 = arith.andi %12, %14 : vector<8x512xi1>
    %cst_4 = arith.constant 0.000000e+00 : f32
    %16 = vector.broadcast %cst_4 : f32 to vector<8x512xf32>
    %17 = arith.select %15, %10, %16 : vector<8x512xi1>, vector<8x512xf32>
    %18 = arith.addf %8, %17 : vector<8x512xf32>
    %19 = vector.extract_strided_slice %2 {offsets = [8, 0], sizes = [8, 512], strides = [1, 1]} : vector<72x512xf32> to vector<8x512xf32>
    %c16_i32_5 = arith.constant 16 : i32
    %20 = tpu.dynamic_rotate %19 by %c16_i32_5 dim 1 : vector<8x512xf32>, i32 -> vector<8x512xf32>
    %c16_i32_6 = arith.constant 16 : i32
    %21 = vector.broadcast %c16_i32_6 : i32 to vector<8x512xi32>
    %22 = arith.cmpi sge, %5, %21 : vector<8x512xi32>
    %cst_7 = arith.constant 0.000000e+00 : f32
    %23 = vector.broadcast %cst_7 : f32 to vector<8x512xf32>
    %24 = arith.select %22, %20, %23 : vector<8x512xi1>, vector<8x512xf32>
    %25 = arith.addf %18, %24 : vector<8x512xf32>
    %26 = vector.extract_strided_slice %2 {offsets = [16, 0], sizes = [8, 512], strides = [1, 1]} : vector<72x512xf32> to vector<8x512xf32>
    %c15_i32_8 = arith.constant 15 : i32
    %27 = tpu.dynamic_rotate %26 by %c15_i32_8 dim 1 : vector<8x512xf32>, i32 -> vector<8x512xf32>
    %c16_i32_9 = arith.constant 16 : i32
    %28 = vector.broadcast %c16_i32_9 : i32 to vector<8x512xi32>
    %29 = arith.cmpi sge, %5, %28 : vector<8x512xi32>
    %c15_i32_10 = arith.constant 15 : i32
    %30 = vector.broadcast %c15_i32_10 : i32 to vector<8x512xi32>
    %31 = arith.cmpi slt, %7, %30 : vector<8x512xi32>
    %32 = arith.andi %29, %31 : vector<8x512xi1>
    %cst_11 = arith.constant 0.000000e+00 : f32
    %33 = vector.broadcast %cst_11 : f32 to vector<8x512xf32>
    %34 = arith.select %32, %27, %33 : vector<8x512xi1>, vector<8x512xf32>
    %35 = arith.addf %25, %34 : vector<8x512xf32>
    %36 = vector.extract_strided_slice %2 {offsets = [24, 0], sizes = [8, 512], strides = [1, 1]} : vector<72x512xf32> to vector<8x512xf32>
    %c1_i32_12 = arith.constant 1 : i32
    %37 = tpu.dynamic_rotate %36 by %c1_i32_12 dim 1 : vector<8x512xf32>, i32 -> vector<8x512xf32>
    %c1_i32_13 = arith.constant 1 : i32
    %38 = vector.broadcast %c1_i32_13 : i32 to vector<8x512xi32>
    %39 = arith.cmpi sge, %7, %38 : vector<8x512xi32>
    %cst_14 = arith.constant 0.000000e+00 : f32
    %40 = vector.broadcast %cst_14 : f32 to vector<8x512xf32>
    %41 = arith.select %39, %37, %40 : vector<8x512xi1>, vector<8x512xf32>
    %42 = arith.addf %35, %41 : vector<8x512xf32>
    %43 = vector.extract_strided_slice %2 {offsets = [32, 0], sizes = [8, 512], strides = [1, 1]} : vector<72x512xf32> to vector<8x512xf32>
    %44 = arith.addf %42, %43 : vector<8x512xf32>
    %45 = vector.extract_strided_slice %2 {offsets = [40, 0], sizes = [8, 512], strides = [1, 1]} : vector<72x512xf32> to vector<8x512xf32>
    %c511_i32 = arith.constant 511 : i32
    %46 = tpu.dynamic_rotate %45 by %c511_i32 dim 1 : vector<8x512xf32>, i32 -> vector<8x512xf32>
    %c15_i32_15 = arith.constant 15 : i32
    %47 = vector.broadcast %c15_i32_15 : i32 to vector<8x512xi32>
    %48 = arith.cmpi slt, %7, %47 : vector<8x512xi32>
    %cst_16 = arith.constant 0.000000e+00 : f32
    %49 = vector.broadcast %cst_16 : f32 to vector<8x512xf32>
    %50 = arith.select %48, %46, %49 : vector<8x512xi1>, vector<8x512xf32>
    %51 = arith.addf %44, %50 : vector<8x512xf32>
    %52 = vector.extract_strided_slice %2 {offsets = [48, 0], sizes = [8, 512], strides = [1, 1]} : vector<72x512xf32> to vector<8x512xf32>
    %c497_i32 = arith.constant 497 : i32
    %53 = tpu.dynamic_rotate %52 by %c497_i32 dim 1 : vector<8x512xf32>, i32 -> vector<8x512xf32>
    %c240_i32 = arith.constant 240 : i32
    %54 = vector.broadcast %c240_i32 : i32 to vector<8x512xi32>
    %55 = arith.cmpi slt, %5, %54 : vector<8x512xi32>
    %c1_i32_17 = arith.constant 1 : i32
    %56 = vector.broadcast %c1_i32_17 : i32 to vector<8x512xi32>
    %57 = arith.cmpi sge, %7, %56 : vector<8x512xi32>
    %58 = arith.andi %55, %57 : vector<8x512xi1>
    %cst_18 = arith.constant 0.000000e+00 : f32
    %59 = vector.broadcast %cst_18 : f32 to vector<8x512xf32>
    %60 = arith.select %58, %53, %59 : vector<8x512xi1>, vector<8x512xf32>
    %61 = arith.addf %51, %60 : vector<8x512xf32>
    %62 = vector.extract_strided_slice %2 {offsets = [56, 0], sizes = [8, 512], strides = [1, 1]} : vector<72x512xf32> to vector<8x512xf32>
    %c496_i32 = arith.constant 496 : i32
    %63 = tpu.dynamic_rotate %62 by %c496_i32 dim 1 : vector<8x512xf32>, i32 -> vector<8x512xf32>
    %c240_i32_19 = arith.constant 240 : i32
    %64 = vector.broadcast %c240_i32_19 : i32 to vector<8x512xi32>
    %65 = arith.cmpi slt, %5, %64 : vector<8x512xi32>
    %cst_20 = arith.constant 0.000000e+00 : f32
    %66 = vector.broadcast %cst_20 : f32 to vector<8x512xf32>
    %67 = arith.select %65, %63, %66 : vector<8x512xi1>, vector<8x512xf32>
    %68 = arith.addf %61, %67 : vector<8x512xf32>
    %69 = vector.extract_strided_slice %2 {offsets = [64, 0], sizes = [8, 512], strides = [1, 1]} : vector<72x512xf32> to vector<8x512xf32>
    %c495_i32 = arith.constant 495 : i32
    %70 = tpu.dynamic_rotate %69 by %c495_i32 dim 1 : vector<8x512xf32>, i32 -> vector<8x512xf32>
    %c240_i32_21 = arith.constant 240 : i32
    %71 = vector.broadcast %c240_i32_21 : i32 to vector<8x512xi32>
    %72 = arith.cmpi slt, %5, %71 : vector<8x512xi32>
    %c15_i32_22 = arith.constant 15 : i32
    %73 = vector.broadcast %c15_i32_22 : i32 to vector<8x512xi32>
    %74 = arith.cmpi slt, %7, %73 : vector<8x512xi32>
    %75 = arith.andi %72, %74 : vector<8x512xi1>
    %cst_23 = arith.constant 0.000000e+00 : f32
    %76 = vector.broadcast %cst_23 : f32 to vector<8x512xf32>
    %77 = arith.select %75, %70, %76 : vector<8x512xi1>, vector<8x512xf32>
    %78 = arith.addf %68, %77 : vector<8x512xf32>
    %c0_24 = arith.constant 0 : index
    %c0_25 = arith.constant 0 : index
    %79 = vector.load %arg5[%c0_24, %c0_25] : memref<8x1xf32, #tpu.memory_space<vmem>>, vector<8x1xf32>
    %c0_26 = arith.constant 0 : index
    %c0_27 = arith.constant 0 : index
    %80 = vector.load %arg6[%c0_26, %c0_27] : memref<8x1xf32, #tpu.memory_space<vmem>>, vector<8x1xf32>
    %cst_28 = arith.constant dense<0.000000e+00> : vector<8xf32>
    %81 = vector.multi_reduction <add>, %78, %cst_28 [1] : vector<8x512xf32> to vector<8xf32>
    %82 = vector.shape_cast %81 : vector<8xf32> to vector<8x1xf32>
    %83 = arith.mulf %78, %78 : vector<8x512xf32>
    %cst_29 = arith.constant dense<0.000000e+00> : vector<8xf32>
    %84 = vector.multi_reduction <add>, %83, %cst_29 [1] : vector<8x512xf32> to vector<8xf32>
    %85 = vector.shape_cast %84 : vector<8xf32> to vector<8x1xf32>
    %cst_30 = arith.constant 0.001953125 : f32
    %86 = vector.broadcast %cst_30 : f32 to vector<8x1xf32>
    %87 = arith.mulf %82, %86 : vector<8x1xf32>
    %cst_31 = arith.constant 0.001953125 : f32
    %88 = vector.broadcast %cst_31 : f32 to vector<8x1xf32>
    %89 = arith.mulf %85, %88 : vector<8x1xf32>
    %90 = arith.mulf %87, %87 : vector<8x1xf32>
    %91 = arith.subf %89, %90 : vector<8x1xf32>
    %cst_32 = arith.constant 9.99999974E-6 : f32
    %92 = vector.broadcast %cst_32 : f32 to vector<8x1xf32>
    %93 = arith.addf %91, %92 : vector<8x1xf32>
    %94 = math.rsqrt %93 : vector<8x1xf32>
    %95 = arith.mulf %79, %94 : vector<8x1xf32>
    %96 = arith.mulf %87, %95 : vector<8x1xf32>
    %97 = arith.subf %80, %96 : vector<8x1xf32>
    %98 = vector.broadcast %95 : vector<8x1xf32> to vector<8x512xf32>
    %99 = arith.mulf %78, %98 : vector<8x512xf32>
    %100 = vector.broadcast %97 : vector<8x1xf32> to vector<8x512xf32>
    %101 = arith.addf %99, %100 : vector<8x512xf32>
    %cst_33 = arith.constant 0.000000e+00 : f32
    %102 = vector.broadcast %cst_33 : f32 to vector<8x512xf32>
    %103 = arith.maximumf %101, %102 : vector<8x512xf32>
    %c0_34 = arith.constant 0 : index
    %c0_35 = arith.constant 0 : index
    %104 = vector.load %arg3[%c0_34, %c0_35] : memref<72x8xf32, #tpu.memory_space<vmem>>, vector<72x8xf32>
    %cst_36 = arith.constant dense<0.000000e+00> : vector<72x512xf32>
    %105 = tpu.matmul %104, %103, %cst_36 {dimension_numbers = #tpu.dot_dimension_numbers<[1], [0], [0], [1], [0, 0, 1, 1], [], []>} : vector<72x8xf32>, vector<8x512xf32>, vector<72x512xf32> -> vector<72x512xf32>
    %106 = tpu.iota {dimensions = array<i32: 1>} : vector<8x512xi32>
    %c255_i32_37 = arith.constant 255 : i32
    %107 = vector.broadcast %c255_i32_37 : i32 to vector<8x512xi32>
    %108 = arith.andi %106, %107 : vector<8x512xi32>
    %c15_i32_38 = arith.constant 15 : i32
    %109 = vector.broadcast %c15_i32_38 : i32 to vector<8x512xi32>
    %110 = arith.andi %106, %109 : vector<8x512xi32>
    %cst_39 = arith.constant 0.000000e+00 : f32
    %111 = vector.broadcast %cst_39 : f32 to vector<8x512xf32>
    %112 = vector.extract_strided_slice %105 {offsets = [0, 0], sizes = [8, 512], strides = [1, 1]} : vector<72x512xf32> to vector<8x512xf32>
    %c17_i32_40 = arith.constant 17 : i32
    %113 = tpu.dynamic_rotate %112 by %c17_i32_40 dim 1 : vector<8x512xf32>, i32 -> vector<8x512xf32>
    %c16_i32_41 = arith.constant 16 : i32
    %114 = vector.broadcast %c16_i32_41 : i32 to vector<8x512xi32>
    %115 = arith.cmpi sge, %108, %114 : vector<8x512xi32>
    %c1_i32_42 = arith.constant 1 : i32
    %116 = vector.broadcast %c1_i32_42 : i32 to vector<8x512xi32>
    %117 = arith.cmpi sge, %110, %116 : vector<8x512xi32>
    %118 = arith.andi %115, %117 : vector<8x512xi1>
    %cst_43 = arith.constant 0.000000e+00 : f32
    %119 = vector.broadcast %cst_43 : f32 to vector<8x512xf32>
    %120 = arith.select %118, %113, %119 : vector<8x512xi1>, vector<8x512xf32>
    %121 = arith.addf %111, %120 : vector<8x512xf32>
    %122 = vector.extract_strided_slice %105 {offsets = [8, 0], sizes = [8, 512], strides = [1, 1]} : vector<72x512xf32> to vector<8x512xf32>
    %c16_i32_44 = arith.constant 16 : i32
    %123 = tpu.dynamic_rotate %122 by %c16_i32_44 dim 1 : vector<8x512xf32>, i32 -> vector<8x512xf32>
    %c16_i32_45 = arith.constant 16 : i32
    %124 = vector.broadcast %c16_i32_45 : i32 to vector<8x512xi32>
    %125 = arith.cmpi sge, %108, %124 : vector<8x512xi32>
    %cst_46 = arith.constant 0.000000e+00 : f32
    %126 = vector.broadcast %cst_46 : f32 to vector<8x512xf32>
    %127 = arith.select %125, %123, %126 : vector<8x512xi1>, vector<8x512xf32>
    %128 = arith.addf %121, %127 : vector<8x512xf32>
    %129 = vector.extract_strided_slice %105 {offsets = [16, 0], sizes = [8, 512], strides = [1, 1]} : vector<72x512xf32> to vector<8x512xf32>
    %c15_i32_47 = arith.constant 15 : i32
    %130 = tpu.dynamic_rotate %129 by %c15_i32_47 dim 1 : vector<8x512xf32>, i32 -> vector<8x512xf32>
    %c16_i32_48 = arith.constant 16 : i32
    %131 = vector.broadcast %c16_i32_48 : i32 to vector<8x512xi32>
    %132 = arith.cmpi sge, %108, %131 : vector<8x512xi32>
    %c15_i32_49 = arith.constant 15 : i32
    %133 = vector.broadcast %c15_i32_49 : i32 to vector<8x512xi32>
    %134 = arith.cmpi slt, %110, %133 : vector<8x512xi32>
    %135 = arith.andi %132, %134 : vector<8x512xi1>
    %cst_50 = arith.constant 0.000000e+00 : f32
    %136 = vector.broadcast %cst_50 : f32 to vector<8x512xf32>
    %137 = arith.select %135, %130, %136 : vector<8x512xi1>, vector<8x512xf32>
    %138 = arith.addf %128, %137 : vector<8x512xf32>
    %139 = vector.extract_strided_slice %105 {offsets = [24, 0], sizes = [8, 512], strides = [1, 1]} : vector<72x512xf32> to vector<8x512xf32>
    %c1_i32_51 = arith.constant 1 : i32
    %140 = tpu.dynamic_rotate %139 by %c1_i32_51 dim 1 : vector<8x512xf32>, i32 -> vector<8x512xf32>
    %c1_i32_52 = arith.constant 1 : i32
    %141 = vector.broadcast %c1_i32_52 : i32 to vector<8x512xi32>
    %142 = arith.cmpi sge, %110, %141 : vector<8x512xi32>
    %cst_53 = arith.constant 0.000000e+00 : f32
    %143 = vector.broadcast %cst_53 : f32 to vector<8x512xf32>
    %144 = arith.select %142, %140, %143 : vector<8x512xi1>, vector<8x512xf32>
    %145 = arith.addf %138, %144 : vector<8x512xf32>
    %146 = vector.extract_strided_slice %105 {offsets = [32, 0], sizes = [8, 512], strides = [1, 1]} : vector<72x512xf32> to vector<8x512xf32>
    %147 = arith.addf %145, %146 : vector<8x512xf32>
    %148 = vector.extract_strided_slice %105 {offsets = [40, 0], sizes = [8, 512], strides = [1, 1]} : vector<72x512xf32> to vector<8x512xf32>
    %c511_i32_54 = arith.constant 511 : i32
    %149 = tpu.dynamic_rotate %148 by %c511_i32_54 dim 1 : vector<8x512xf32>, i32 -> vector<8x512xf32>
    %c15_i32_55 = arith.constant 15 : i32
    %150 = vector.broadcast %c15_i32_55 : i32 to vector<8x512xi32>
    %151 = arith.cmpi slt, %110, %150 : vector<8x512xi32>
    %cst_56 = arith.constant 0.000000e+00 : f32
    %152 = vector.broadcast %cst_56 : f32 to vector<8x512xf32>
    %153 = arith.select %151, %149, %152 : vector<8x512xi1>, vector<8x512xf32>
    %154 = arith.addf %147, %153 : vector<8x512xf32>
    %155 = vector.extract_strided_slice %105 {offsets = [48, 0], sizes = [8, 512], strides = [1, 1]} : vector<72x512xf32> to vector<8x512xf32>
    %c497_i32_57 = arith.constant 497 : i32
    %156 = tpu.dynamic_rotate %155 by %c497_i32_57 dim 1 : vector<8x512xf32>, i32 -> vector<8x512xf32>
    %c240_i32_58 = arith.constant 240 : i32
    %157 = vector.broadcast %c240_i32_58 : i32 to vector<8x512xi32>
    %158 = arith.cmpi slt, %108, %157 : vector<8x512xi32>
    %c1_i32_59 = arith.constant 1 : i32
    %159 = vector.broadcast %c1_i32_59 : i32 to vector<8x512xi32>
    %160 = arith.cmpi sge, %110, %159 : vector<8x512xi32>
    %161 = arith.andi %158, %160 : vector<8x512xi1>
    %cst_60 = arith.constant 0.000000e+00 : f32
    %162 = vector.broadcast %cst_60 : f32 to vector<8x512xf32>
    %163 = arith.select %161, %156, %162 : vector<8x512xi1>, vector<8x512xf32>
    %164 = arith.addf %154, %163 : vector<8x512xf32>
    %165 = vector.extract_strided_slice %105 {offsets = [56, 0], sizes = [8, 512], strides = [1, 1]} : vector<72x512xf32> to vector<8x512xf32>
    %c496_i32_61 = arith.constant 496 : i32
    %166 = tpu.dynamic_rotate %165 by %c496_i32_61 dim 1 : vector<8x512xf32>, i32 -> vector<8x512xf32>
    %c240_i32_62 = arith.constant 240 : i32
    %167 = vector.broadcast %c240_i32_62 : i32 to vector<8x512xi32>
    %168 = arith.cmpi slt, %108, %167 : vector<8x512xi32>
    %cst_63 = arith.constant 0.000000e+00 : f32
    %169 = vector.broadcast %cst_63 : f32 to vector<8x512xf32>
    %170 = arith.select %168, %166, %169 : vector<8x512xi1>, vector<8x512xf32>
    %171 = arith.addf %164, %170 : vector<8x512xf32>
    %172 = vector.extract_strided_slice %105 {offsets = [64, 0], sizes = [8, 512], strides = [1, 1]} : vector<72x512xf32> to vector<8x512xf32>
    %c495_i32_64 = arith.constant 495 : i32
    %173 = tpu.dynamic_rotate %172 by %c495_i32_64 dim 1 : vector<8x512xf32>, i32 -> vector<8x512xf32>
    %c240_i32_65 = arith.constant 240 : i32
    %174 = vector.broadcast %c240_i32_65 : i32 to vector<8x512xi32>
    %175 = arith.cmpi slt, %108, %174 : vector<8x512xi32>
    %c15_i32_66 = arith.constant 15 : i32
    %176 = vector.broadcast %c15_i32_66 : i32 to vector<8x512xi32>
    %177 = arith.cmpi slt, %110, %176 : vector<8x512xi32>
    %178 = arith.andi %175, %177 : vector<8x512xi1>
    %cst_67 = arith.constant 0.000000e+00 : f32
    %179 = vector.broadcast %cst_67 : f32 to vector<8x512xf32>
    %180 = arith.select %178, %173, %179 : vector<8x512xi1>, vector<8x512xf32>
    %181 = arith.addf %171, %180 : vector<8x512xf32>
    %c0_68 = arith.constant 0 : index
    %c0_69 = arith.constant 0 : index
    %182 = vector.load %arg7[%c0_68, %c0_69] : memref<8x1xf32, #tpu.memory_space<vmem>>, vector<8x1xf32>
    %c0_70 = arith.constant 0 : index
    %c0_71 = arith.constant 0 : index
    %183 = vector.load %arg8[%c0_70, %c0_71] : memref<8x1xf32, #tpu.memory_space<vmem>>, vector<8x1xf32>
    %cst_72 = arith.constant dense<0.000000e+00> : vector<8xf32>
    %184 = vector.multi_reduction <add>, %181, %cst_72 [1] : vector<8x512xf32> to vector<8xf32>
    %185 = vector.shape_cast %184 : vector<8xf32> to vector<8x1xf32>
    %186 = arith.mulf %181, %181 : vector<8x512xf32>
    %cst_73 = arith.constant dense<0.000000e+00> : vector<8xf32>
    %187 = vector.multi_reduction <add>, %186, %cst_73 [1] : vector<8x512xf32> to vector<8xf32>
    %188 = vector.shape_cast %187 : vector<8xf32> to vector<8x1xf32>
    %cst_74 = arith.constant 0.001953125 : f32
    %189 = vector.broadcast %cst_74 : f32 to vector<8x1xf32>
    %190 = arith.mulf %185, %189 : vector<8x1xf32>
    %cst_75 = arith.constant 0.001953125 : f32
    %191 = vector.broadcast %cst_75 : f32 to vector<8x1xf32>
    %192 = arith.mulf %188, %191 : vector<8x1xf32>
    %193 = arith.mulf %190, %190 : vector<8x1xf32>
    %194 = arith.subf %192, %193 : vector<8x1xf32>
    %cst_76 = arith.constant 9.99999974E-6 : f32
    %195 = vector.broadcast %cst_76 : f32 to vector<8x1xf32>
    %196 = arith.addf %194, %195 : vector<8x1xf32>
    %197 = math.rsqrt %196 : vector<8x1xf32>
    %198 = arith.mulf %182, %197 : vector<8x1xf32>
    %199 = arith.mulf %190, %198 : vector<8x1xf32>
    %200 = arith.subf %183, %199 : vector<8x1xf32>
    %201 = vector.broadcast %198 : vector<8x1xf32> to vector<8x512xf32>
    %202 = arith.mulf %181, %201 : vector<8x512xf32>
    %203 = vector.broadcast %200 : vector<8x1xf32> to vector<8x512xf32>
    %204 = arith.addf %202, %203 : vector<8x512xf32>
    %cst_77 = arith.constant 0.000000e+00 : f32
    %205 = vector.broadcast %cst_77 : f32 to vector<8x512xf32>
    %206 = arith.maximumf %204, %205 : vector<8x512xf32>
    %c0_78 = arith.constant 0 : index
    %c0_79 = arith.constant 0 : index
    %207 = vector.load %arg4[%c0_78, %c0_79] : memref<16x8xf32, #tpu.memory_space<vmem>>, vector<16x8xf32>
    %cst_80 = arith.constant dense<0.000000e+00> : vector<16x512xf32>
    %208 = tpu.matmul %207, %206, %cst_80 {dimension_numbers = #tpu.dot_dimension_numbers<[1], [0], [0], [1], [0, 0, 1, 1], [], []>} : vector<16x8xf32>, vector<8x512xf32>, vector<16x512xf32> -> vector<16x512xf32>
    %c0_81 = arith.constant 0 : index
    %c0_82 = arith.constant 0 : index
    %209 = vector.load %arg9[%c0_81, %c0_82] : memref<16x1xf32, #tpu.memory_space<vmem>>, vector<16x1xf32>
    %210 = vector.broadcast %209 : vector<16x1xf32> to vector<16x512xf32>
    %211 = arith.addf %208, %210 : vector<16x512xf32>
    %c0_83 = arith.constant 0 : index
    %c0_84 = arith.constant 0 : index
    %212 = vector.load %arg10[%c0_83, %c0_84] : memref<16x512xf32, #tpu.memory_space<vmem>>, vector<16x512xf32>
    tpu.vector_store %arg10[%c0_83, %c0_84], %211 {strides = array<i32>} : memref<16x512xf32, #tpu.memory_space<vmem>>, vector<16x512xf32>,
    return
  }
  func.func @transform_0(%arg0: i32) -> (i32, i32) {
    %c0_i32 = arith.constant 0 : i32
    %c0_i32_0 = arith.constant 0 : i32
    %c0_i32_1 = arith.constant 0 : i32
    return %c0_i32, %c0_i32_0 : i32, i32
  }
  func.func @transform_1(%arg0: i32) -> (i32, i32) {
    %c0_i32 = arith.constant 0 : i32
    %c0_i32_0 = arith.constant 0 : i32
    %c0_i32_1 = arith.constant 0 : i32
    return %c0_i32, %c0_i32_0 : i32, i32
  }
  func.func @transform_2(%arg0: i32) -> (i32, i32) {
    %c0_i32 = arith.constant 0 : i32
    %c0_i32_0 = arith.constant 0 : i32
    %c0_i32_1 = arith.constant 0 : i32
    return %c0_i32, %c0_i32_0 : i32, i32
  }
  func.func @transform_3(%arg0: i32) -> (i32, i32) {
    %c0_i32 = arith.constant 0 : i32
    %c0_i32_0 = arith.constant 0 : i32
    %c0_i32_1 = arith.constant 0 : i32
    return %c0_i32, %c0_i32_0 : i32, i32
  }
  func.func @transform_4(%arg0: i32) -> (i32, i32) {
    %c0_i32 = arith.constant 0 : i32
    %c0_i32_0 = arith.constant 0 : i32
    %c0_i32_1 = arith.constant 0 : i32
    return %c0_i32, %c0_i32_0 : i32, i32
  }
  func.func @transform_5(%arg0: i32) -> (i32, i32) {
    %c0_i32 = arith.constant 0 : i32
    %c0_i32_0 = arith.constant 0 : i32
    %c0_i32_1 = arith.constant 0 : i32
    return %c0_i32, %c0_i32_0 : i32, i32
  }
  func.func @transform_6(%arg0: i32) -> (i32, i32) {
    %c0_i32 = arith.constant 0 : i32
    %c0_i32_0 = arith.constant 0 : i32
    %c0_i32_1 = arith.constant 0 : i32
    return %c0_i32, %c0_i32_0 : i32, i32
  }
  func.func @transform_7(%arg0: i32) -> (i32, i32) {
    %c0_i32 = arith.constant 0 : i32
    %c0_i32_0 = arith.constant 0 : i32
    %c0_i32_1 = arith.constant 0 : i32
    return %c0_i32, %c0_i32_0 : i32, i32
  }
  func.func @transform_8(%arg0: i32) -> (i32, i32) {
    %c0_i32 = arith.constant 0 : i32
    %c0_i32_0 = arith.constant 0 : i32
    %c0_i32_1 = arith.constant 0 : i32
    return %c0_i32, %c0_i32_0 : i32, i32
  }
  func.func @transform_9(%arg0: i32) -> (i32, i32) {
    %c0_i32 = arith.constant 0 : i32
    %c0_i32_0 = arith.constant 0 : i32
    %c0_i32_1 = arith.constant 0 : i32
    return %c0_i32, %c0_i32_0 : i32, i32
  }
}

</mosaic_0001>

<bundles_post_ra>
// kernel: tile.0
= control target key start
LH: loop header
LB: loop body
LE: loop exit
PB: predicated region body
PF: predicated region fallthrough
CT: control target
= control target key end

     0   :  { %s34_s8 = smov 125   ;;  %vm7_vm0 = vcmask 7168   ;;  %s35_s11 = smov 126   ;;  %s61_s0 = inlined_call_operand.vmem [shape: f32[4,4], index: 0, kind: input, shape index: {}]   ;;  %s62_s1 = inlined_call_operand.vmem [shape: f32[16,1], index: 1, kind: output, shape index: {}]  }
   0x1   :  { %v4_v0 = vld [vmem:[%s61_s0] sm:$0xf]  ;;  %s33_s0 = smov 127  }
   0x2   :  { %5 = vst [vmem:[#allocation0] sm:$0xf] %v4_v0 }
   0x9   :  { %v9_v1 = vld [vmem:[#allocation0] sm:$0xf]  }
   0xa   :  { %v21_v2 = vld [vmem:[#allocation0] sm:$0xf]   ;;  %10 = vrot.lane.b32.xlu0 %v9_v1, %s33_s0 }
   0xb   :  { %22 = vrot.lane.b32.xlu1 %v21_v2, %s34_s8  ;;  %v6_v3 = vld [vmem:[#allocation0] sm:$0xf]  }
   0xc   :  { %v15_v4 = vld [vmem:[#allocation0] sm:$0xf]   ;;  %8 = vst.msk [vmem:[%s62_s1] ss:$4 sm:$0xf] %vm7_vm0, %v6_v3  }
   0xe   :  { %16 = vrot.lane.b32.xlu0 %v15_v4, %s35_s11 }
  0x7c   :  { %v11_v5 = vpop.permute.xlu0 %10  }
  0x7d   :  { %v23_v6 = vpop.permute.xlu1 %22   ;;  %27 = vst.msk [vmem:[%s62_s1 + $0x1] ss:$4 sm:$0xf] %vm7_vm0, %v11_v5  }
  0x7e   :  { %29 = vst.msk [vmem:[%s62_s1 + $0x3] ss:$4 sm:$0xf] %vm7_vm0, %v23_v6  }
  0x80   :  { %v17_v7 = vpop.permute.xlu0 %16  }
  0x81   :  { %28 = vst.msk [vmem:[%s62_s1 + $0x2] ss:$4 sm:$0xf] %vm7_vm0, %v17_v7  }

// kernel: tile.8
= control target key start
LH: loop header
LB: loop body
LE: loop exit
PB: predicated region body
PF: predicated region fallthrough
CT: control target
= control target key end

     0   :  { %s22_s0 = inlined_call_operand.vmem [shape: f32[4], index: 0, kind: input, shape index: {}]   ;;  %s23_s1 = inlined_call_operand.vmem [shape: f32[4,4], index: 1, kind: output, shape index: {}]  }
   0x1   :  { %v4_v0 = vld [vmem:[%s22_s0] ss:$0 sm:$0xff] }
   0x2   :  { %5 = vst [vmem:[%s23_s1] sm:$0xf] %v4_v0 }

// kernel: upconv_forward.1
= control target key start
LH: loop header
LB: loop body
LE: loop exit
PB: predicated region body
PF: predicated region fallthrough
CT: control target
= control target key end

     0   :  { %vm75_vm0 = vcmask 1043456   ;;  %v1320_v2 = vmov 0.0   ;;  %vm47_vm1 = vcmask 31744   ;;  %s1321_s30 = smov 17   ;;  %s1323_s10 = smov 15   ;;  %v322_v61 = vlaneseq  ;;  %s2119_s0 = inlined_call_operand.vmem [shape: f32[4,512], index: 0, kind: input, shape index: {}]   ;;  %s2120_s1 = inlined_call_operand.vmem [shape: f32[72,4], index: 1, kind: input, shape index: {}]   ;;  %s2121_s4 = inlined_call_operand.vmem [shape: f32[8,1], index: 4, kind: input, shape index: {}]   ;;  %s2122_s5 = inlined_call_operand.vmem [shape: f32[8,1], index: 5, kind: input, shape index: {}]   ;;  %s2123_s2 = inlined_call_operand.vmem [shape: f32[72,8], index: 2, kind: input, shape index: {}]   ;;  %s2124_s6 = inlined_call_operand.vmem [shape: f32[8,1], index: 6, kind: input, shape index: {}]   ;;  %s2125_s7 = inlined_call_operand.vmem [shape: f32[8,1], index: 7, kind: input, shape index: {}]   ;;  %s2126_s8 = inlined_call_operand.vmem [shape: f32[16,1], index: 8, kind: input, shape index: {}]   ;;  %s2127_s3 = inlined_call_operand.vmem [shape: f32[16,8], index: 3, kind: input, shape index: {}]   ;;  %s2128_s9 = inlined_call_operand.vmem [shape: f32[16,512], index: 9, kind: output, shape index: {}]  }
   0x1   :  { %v32_v0 = vld [vmem:[%s2119_s0] sm:$0xff]  ;;  %v33_v1 = vld [vmem:[%s2119_s0 + $0x8] sm:$0xff]  ;;  %148 = vmatprep.mubr.f32.mxu0 %v1320_v2  ;;  %267 = vmatprep.mubr.f32.mxu1 %v1320_v2  ;;  %v36_v7 = vld [vmem:[%s2120_s1 + $0x10] sm:$0xff]  ;;  %s1324_s11 = smov 1   ;;  %s1325_s12 = smov 127  }
   0x2   :  { %v45_v3 = vcombine.high %v32_v0, %v32_v0  ;;  %v46_v4 = vcombine.high %v33_v1, %v33_v1  ;;  %v34_v5 = vld [vmem:[%s2120_s1] sm:$0xff]  ;;  %v35_v6 = vld [vmem:[%s2120_s1 + $0x8] sm:$0xff]  ;;  %v37_v8 = vld [vmem:[%s2120_s1 + $0x18] sm:$0xff]  ;;  %s1326_s13 = smov 113   ;;  %s1327_s14 = smov 112  }
   0x3   :  { %v38_v9 = vld [vmem:[%s2120_s1 + $0x20] sm:$0xff]  ;;  %v39_v10 = vld [vmem:[%s2120_s1 + $0x28] sm:$0xff]  ;;  %v40_v11 = vld [vmem:[%s2120_s1 + $0x30] sm:$0xff]  ;;  %s1328_s0 = smov 111  }
   0x4   :  { %1258 = vmatprep.subr.msk.mxu0 %vm75_vm0, %v45_v3  ;;  %1269 = vmatprep.subr.msk.mxu1 %vm75_vm0, %v46_v4  ;;  %v41_v12 = vld [vmem:[%s2120_s1 + $0x38] sm:$0xff]  ;;  %v42_v13 = vld [vmem:[%s2120_s1 + $0x40] sm:$0xff]  ;;  %s1322_s1 = smov 16  }
   0x5   :  { %1259 = vmatpush1.msk.msra.mxu0 %vm75_vm0, %v32_v0  ;;  %1270 = vmatpush1.msk.msra.mxu1 %vm75_vm0, %v33_v1  ;;  %v1505_v0 = vand.u32 127, %v322_v61 }
   0x6   :  { %1260 = vmatmul.mubr.msk.f32.vlgmr.msra.gmra.mrb[0].mxu0 %vm47_vm1, %v34_v5  ;;  %1271 = vmatmul.mubr.msk.f32.vlgmr.msra.gmra.mrb[0].mxu1 %vm47_vm1, %v34_v5 }
   0x7   :  { %154 = vmatprep.mubr.f32.mxu0 %v1320_v2  ;;  %273 = vmatprep.mubr.f32.mxu1 %v1320_v2  ;;  %v1510_v3 = vadd.s32 384, %v1505_v0  ;;  %v325_v4 = vadd.s32 256, %v1505_v0  ;;  %vm2129_vm2 = vcmp.lt.s32.totalorder %v1505_v0, 16  ;;  %vm2135_vm5 = vcmp.lt.s32.totalorder %v1505_v0, 17 }
   0x8   :  { %vm2130_vm6 = vcmp.lt.s32.totalorder %v1505_v0, 15  ;;  %vm2134_vm11 = vcmp.lt.s32.totalorder %v1505_v0, 1 }
   0xa   :  { %1261 = vmatmul.mubr.msk.f32.gmra.mrb[2].mxu0 %vm47_vm1, %v35_v6  ;;  %1272 = vmatmul.mubr.msk.f32.gmra.mrb[2].mxu1 %vm47_vm1, %v35_v6  ;;  %v327_v6 = vand.u32 255, %v1505_v0 }
   0xb   :  { %160 = vmatprep.mubr.f32.mxu0 %v1320_v2  ;;  %279 = vmatprep.mubr.f32.mxu1 %v1320_v2 }
   0xc   :  { %vm1522_vm3 = vcmp.ge.s32.totalorder %v327_v6, 16 }
   0xe   :  { %1262 = vmatmul.mubr.msk.f32.gmra.mrb[4].mxu0 %vm47_vm1, %v36_v7  ;;  %1273 = vmatmul.mubr.msk.f32.gmra.mrb[4].mxu1 %vm47_vm1, %v36_v7  ;;  %v331_v7 = vand.u32 15, %v1505_v0 }
   0xf   :  { %166 = vmatprep.mubr.f32.mxu0 %v1320_v2  ;;  %285 = vmatprep.mubr.f32.mxu1 %v1320_v2 }
  0x10   :  { %vm1526_vm4 = vcmp.ge.s32.totalorder %v331_v7, 1  ;;  %vm1534_vm7 = vcmp.lt.s32.totalorder %v331_v7, 15 }
  0x11   :  { %vm2131_vm8 = vmand %vm1522_vm3, %vm1526_vm4 }
  0x12   :  { %1263 = vmatmul.mubr.msk.f32.gmra.mrb[6].mxu0 %vm47_vm1, %v37_v8  ;;  %1274 = vmatmul.mubr.msk.f32.gmra.mrb[6].mxu1 %vm47_vm1, %v37_v8  ;;  %v324_v8 = vadd.s32 128, %v1505_v0  ;;  %vm2132_vm14 = vmand %vm1522_vm3, %vm1534_vm7 }
  0x13   :  { %172 = vmatprep.mubr.f32.mxu0 %v1320_v2  ;;  %291 = vmatprep.mubr.f32.mxu1 %v1320_v2 }
  0x16   :  { %1264 = vmatmul.mubr.msk.f32.gmra.mrb[8].mxu0 %vm47_vm1, %v38_v9  ;;  %1275 = vmatmul.mubr.msk.f32.gmra.mrb[8].mxu1 %vm47_vm1, %v38_v9 }
  0x17   :  { %178 = vmatprep.mubr.f32.mxu0 %v1320_v2  ;;  %297 = vmatprep.mubr.f32.mxu1 %v1320_v2 }
  0x1a   :  { %1265 = vmatmul.mubr.msk.f32.gmra.mrb[10].mxu0 %vm47_vm1, %v39_v10  ;;  %1276 = vmatmul.mubr.msk.f32.gmra.mrb[10].mxu1 %vm47_vm1, %v39_v10  ;;  %v334_v10 = vand.u32 15, %v1510_v3 }
  0x1b   :  { %184 = vmatprep.mubr.f32.mxu0 %v1320_v2  ;;  %303 = vmatprep.mubr.f32.mxu1 %v1320_v2 }
  0x1c   :  { %vm1545_vm9 = vcmp.ge.s32.totalorder %v334_v10, 1  ;;  %vm1578_vm15 = vcmp.lt.s32.totalorder %v334_v10, 15 }
  0x1e   :  { %1266 = vmatmul.mubr.msk.f32.gmra.mrb[12].mxu0 %vm47_vm1, %v40_v11  ;;  %1277 = vmatmul.mubr.msk.f32.gmra.mrb[12].mxu1 %vm47_vm1, %v40_v11  ;;  %v329_v11 = vand.u32 255, %v325_v4 }
  0x1f   :  { %190 = vmatprep.mubr.f32.mxu0 %v1320_v2  ;;  %309 = vmatprep.mubr.f32.mxu1 %v1320_v2 }
  0x20   :  { %vm1549_vm10 = vcmp.ge.s32.totalorder %v329_v11, 16 }
  0x22   :  { %1267 = vmatmul.mubr.msk.f32.gmra.mrb[14].mxu0 %vm47_vm1, %v41_v12  ;;  %1278 = vmatmul.mubr.msk.f32.gmra.mrb[14].mxu1 %vm47_vm1, %v41_v12 }
  0x23   :  { %196 = vmatprep.mubr.f32.mxu0 %v1320_v2  ;;  %315 = vmatprep.mubr.f32.mxu1 %v1320_v2 }
  0x26   :  { %1268 = vmatmul.mubr.msk.f32.gmra.mrb[16].mxu0 %vm47_vm1, %v42_v13  ;;  %1279 = vmatmul.mubr.msk.f32.gmra.mrb[16].mxu1 %vm47_vm1, %v42_v13 }
  0x27   :  { %687 = vmatprep.mubr.f32.mxu0 %v1320_v2  ;;  %806 = vmatprep.mubr.f32.mxu1 %v1320_v2 }
  0xd9   :  { %v150_v14 = vpop.f32.mrb[0].mxu0  ;;  %v269_v15 = vpop.f32.mrb[0].mxu1 }
  0xda   :  { %v271_v16 = vpop.f32.mrb[1].mxu1  ;;  %335 = vrot.lane.b32.xlu0 %v150_v14, %s1321_s30  ;;  %v152_v17 = vpop.f32.mrb[1].mxu0 }
  0xdb   :  { %341 = vrot.lane.b32.xlu1 %v271_v16, %s1321_s30  ;;  %v333_v16 = vand.u32 15, %v325_v4 }
  0xdd   :  { %v156_v18 = vpop.f32.mrb[2].mxu0  ;;  %v275_v19 = vpop.f32.mrb[2].mxu1  ;;  %vm1563_vm13 = vcmp.ge.s32.totalorder %v333_v16, 1  ;;  %vm1582_vm0 = vcmp.lt.s32.totalorder %v333_v16, 15 }
  0xde   :  { %339 = vrot.lane.b32.xlu0 %v269_v15, %s1321_s30  ;;  %v158_v20 = vpop.f32.mrb[3].mxu0  ;;  %v277_v21 = vpop.f32.mrb[3].mxu1  ;;  %v332_v15 = vand.u32 15, %v324_v8 }
  0xdf   :  { %368 = vrot.lane.b32.xlu1 %v156_v18, %s1322_s1 }
  0xe0   :  { %vm1559_vm12 = vcmp.ge.s32.totalorder %v332_v15, 1  ;;  %vm1586_vm1 = vcmp.lt.s32.totalorder %v332_v15, 15 }
  0xe1   :  { %v162_v22 = vpop.f32.mrb[4].mxu0  ;;  %v281_v23 = vpop.f32.mrb[4].mxu1 }
  0xe2   :  { %337 = vrot.lane.b32.xlu0 %v152_v17, %s1321_s30  ;;  %v164_v24 = vpop.f32.mrb[5].mxu0  ;;  %v283_v25 = vpop.f32.mrb[5].mxu1 }
  0xe3   :  { %372 = vrot.lane.b32.xlu1 %v275_v19, %s1322_s1 }
  0xe5   :  { %v168_v26 = vpop.f32.mrb[6].mxu0  ;;  %v287_v27 = vpop.f32.mrb[6].mxu1 }
  0xe6   :  { %374 = vrot.lane.b32.xlu0 %v277_v21, %s1322_s1  ;;  %v170_v28 = vpop.f32.mrb[7].mxu0  ;;  %v289_v29 = vpop.f32.mrb[7].mxu1  ;;  %v2153_v21 = vmov 0 }
  0xe7   :  { %370 = vrot.lane.b32.xlu1 %v158_v20, %s1322_s1  ;;  %v2154_v21 = vsel %vm1549_vm10, 4294967295, %v2153_v21 }
  0xe9   :  { %v1459_v30 = vpop.f32.mrb[8].mxu0  ;;  %v1461_v31 = vpop.f32.mrb[8].mxu1 }
  0xea   :  { %389 = vrot.lane.b32.xlu0 %v162_v22, %s1323_s10  ;;  %v1464_v32 = vpop.f32.mrb[9].mxu0  ;;  %v1466_v33 = vpop.f32.mrb[9].mxu1 }
  0xeb   :  { %393 = vrot.lane.b32.xlu1 %v281_v23, %s1323_s10 }
  0xed   :  { %v180_v34 = vpop.f32.mrb[10].mxu0  ;;  %v299_v35 = vpop.f32.mrb[10].mxu1 }
  0xee   :  { %395 = vrot.lane.b32.xlu0 %v283_v25, %s1323_s10  ;;  %v182_v36 = vpop.f32.mrb[11].mxu0  ;;  %v301_v37 = vpop.f32.mrb[11].mxu1 }
  0xef   :  { %391 = vrot.lane.b32.xlu1 %v164_v24, %s1323_s10 }
  0xf1   :  { %v186_v38 = vpop.f32.mrb[12].mxu0  ;;  %v305_v39 = vpop.f32.mrb[12].mxu1 }
  0xf2   :  { %418 = vrot.lane.b32.xlu0 %v168_v26, %s1324_s11  ;;  %v188_v40 = vpop.f32.mrb[13].mxu0  ;;  %v307_v41 = vpop.f32.mrb[13].mxu1 }
  0xf3   :  { %422 = vrot.lane.b32.xlu1 %v287_v27, %s1324_s11 }
  0xf5   :  { %v192_v42 = vpop.f32.mrb[14].mxu0  ;;  %v311_v43 = vpop.f32.mrb[14].mxu1 }
  0xf6   :  { %424 = vrot.lane.b32.xlu0 %v289_v29, %s1324_s11  ;;  %v194_v44 = vpop.f32.mrb[15].mxu0  ;;  %v313_v45 = vpop.f32.mrb[15].mxu1 }
  0xf7   :  { %420 = vrot.lane.b32.xlu1 %v170_v28, %s1324_s11 }
  0xf9   :  { %v198_v46 = vpop.f32.mrb[16].mxu0  ;;  %v317_v47 = vpop.f32.mrb[16].mxu1 }
  0xfa   :  { %443 = vrot.lane.b32.xlu0 %v180_v34, %s1325_s12  ;;  %v200_v48 = vpop.f32.mrb[17].mxu0  ;;  %v319_v49 = vpop.f32.mrb[17].mxu1 }
  0xfb   :  { %445 = vrot.lane.b32.xlu1 %v182_v36, %s1325_s12 }
  0xfe   :  { %447 = vrot.lane.b32.xlu0 %v299_v35, %s1325_s12  ;;  %v328_v35 = vand.u32 255, %v324_v8 }
  0xff   :  { %449 = vrot.lane.b32.xlu1 %v301_v37, %s1325_s12 }
 0x102   :  { %464 = vrot.lane.b32.xlu0 %v186_v38, %s1326_s13 }
 0x103   :  { %466 = vrot.lane.b32.xlu1 %v188_v40, %s1326_s13 }
 0x106   :  { %468 = vrot.lane.b32.xlu0 %v305_v39, %s1326_s13 }
 0x107   :  { %470 = vrot.lane.b32.xlu1 %v307_v41, %s1326_s13 }
 0x10a   :  { %493 = vrot.lane.b32.xlu0 %v192_v42, %s1327_s14 }
 0x10b   :  { %497 = vrot.lane.b32.xlu1 %v311_v43, %s1327_s14 }
 0x10e   :  { %495 = vrot.lane.b32.xlu0 %v194_v44, %s1327_s14 }
 0x10f   :  { %514 = vrot.lane.b32.xlu1 %v198_v46, %s1328_s0 }
 0x112   :  { %516 = vrot.lane.b32.xlu0 %v200_v48, %s1328_s0 }
 0x113   :  { %518 = vrot.lane.b32.xlu1 %v317_v47, %s1328_s0  ;;  %v330_v47 = vand.u32 255, %v1510_v3 }
 0x116   :  { %499 = vrot.lane.b32.xlu0 %v313_v45, %s1327_s14 }
 0x117   :  { %520 = vrot.lane.b32.xlu1 %v319_v49, %s1328_s0 }
 0x14c   :  { %v336_v50 = vpop.permute.xlu0 %335 }
 0x14d   :  { %v1491_v51 = vpop.permute.xlu1 %341 }
 0x14e   :  { %v347_v23 = vsel %vm2135_vm5, %v1491_v51, %v336_v50 }
 0x14f   :  { %v360_v38 = vsel %vm2131_vm8, %v347_v23, 0.0 }
 0x150   :  { %v1493_v52 = vpop.permute.xlu0 %339 }
 0x151   :  { %v369_v53 = vpop.permute.xlu1 %368 }
 0x154   :  { %v1495_v54 = vpop.permute.xlu0 %337 }
 0x155   :  { %v1497_v55 = vpop.permute.xlu1 %372  ;;  %v346_v39 = vsel %vm2135_vm5, %v336_v50, %v1495_v54  ;;  %v345_v48 = vsel %vm2135_vm5, %v1495_v54, %v1493_v52 }
 0x158   :  { %v1499_v56 = vpop.permute.xlu0 %374 }
 0x159   :  { %v371_v57 = vpop.permute.xlu1 %370  ;;  %v380_v19 = vsel %vm2129_vm2, %v1499_v56, %v369_v53  ;;  %vm2165_vm2 = vcmp.lt.s32.totalorder %v1505_v0, 15 }
 0x15a   :  { %v381_v28 = vsel %vm1522_vm3, %v380_v19, 0.0 }
 0x15b   :  { %v385_v43 = vadd.f32 %v381_v28, %v360_v38 }
 0x15c   :  { %v390_v58 = vpop.permute.xlu0 %389 }
 0x15d   :  { %v1501_v59 = vpop.permute.xlu1 %393 }
 0x160   :  { %v1503_v60 = vpop.permute.xlu0 %395 }
 0x161   :  { %v392_v62 = vpop.permute.xlu1 %391  ;;  %v401_v26 = vsel %vm2130_vm6, %v1503_v60, %v390_v58  ;;  %vm2166_vm6 = vcmp.lt.s32.totalorder %v1505_v0, 16 }
 0x162   :  { %v410_v40 = vsel %vm2132_vm14, %v401_v26, 0.0  ;;  %v400_v41 = vsel %vm2165_vm2, %v390_v58, %v392_v62  ;;  %v378_v44 = vsel %vm2166_vm6, %v371_v57, %v1497_v55  ;;  %vm2167_vm8 = vmmov %vm2166_vm6  ;;  %vm1630_vm2 = vcmp.lt.s32.totalorder %v328_v35, 240 }
 0x163   :  { %v379_v45 = vsel %vm2167_vm8, %v369_v53, %v371_v57  ;;  %vm2133_vm14 = vmand %vm1549_vm10, %vm1563_vm13  ;;  %v361_v57 = vsel %vm1559_vm12, %v346_v39, 0.0  ;;  %v414_v58 = vadd.f32 %v410_v40, %v385_v43  ;;  %vm2170_vm8 = vcmp.lt.s32.totalorder %v1505_v0, 15 }
 0x164   :  { %v419_v63 = vpop.permute.xlu0 %418  ;;  %v399_v54 = vsel %vm2170_vm8, %v392_v62, %v1501_v59  ;;  %v411_v61 = vsel %vm1586_vm1, %v400_v41, 0.0  ;;  %v383_v3 = vsel %vm1549_vm10, %v378_v44, 0.0  ;;  %v386_v4 = vadd.f32 %v379_v45, %v361_v57  ;;  %vm2171_vm6 = vmmov %vm2170_vm8 }
 0x165   :  { %v1507_v1 = vpop.permute.xlu1 %422  ;;  %v398_v6 = vsel %vm2171_vm6, %v1501_v59, %v1503_v60  ;;  %vm2172_vm8 = vcmp.lt.s32.totalorder %v1505_v0, 16  ;;  %v362_v59 = vsel %vm2133_vm14, %v345_v48, 0.0  ;;  %vm2173_vm6 = vmand %vm1549_vm10, %vm1582_vm0  ;;  %v2179_v45 = vmov 0 }
 0x166   :  { %v377_v62 = vsel %vm2172_vm8, %v1497_v55, %v1499_v56  ;;  %v412_v55 = vsel %vm2173_vm6, %v399_v54, 0.0  ;;  %v415_v56 = vadd.f32 %v411_v61, %v386_v4  ;;  %v387_v11 = vadd.f32 %v383_v3, %v362_v59 }
 0x167   :  { %v413_v15 = vsel %vm1578_vm15, %v398_v6, 0.0  ;;  %vm2174_vm8 = vcmp.lt.s32.totalorder %v1505_v0, 127 }
 0x168   :  { %v1513_v5 = vpop.permute.xlu0 %424  ;;  %vm2175_vm6 = vmmov %vm2174_vm8  ;;  %v416_v28 = vadd.f32 %v412_v55, %v387_v11 }
 0x169   :  { %v421_v9 = vpop.permute.xlu1 %420  ;;  %v430_v37 = vsel %vm2134_vm11, %v1513_v5, %v419_v63  ;;  %v427_v60 = vsel %vm2134_vm11, %v1507_v1, %v1513_v5 }
 0x16a   :  { %v431_v49 = vsel %vm1526_vm4, %v430_v37, 0.0  ;;  %v429_v50 = vsel %vm2134_vm11, %v419_v63, %v421_v9  ;;  %v344_v63 = vsel %vm2135_vm5, %v1493_v52, %v1491_v51  ;;  %v428_v51 = vsel %vm2134_vm11, %v421_v9, %v1507_v1 }
 0x16b   :  { %v435_v8 = vadd.f32 %v431_v49, %v414_v58  ;;  %v432_v52 = vsel %vm1559_vm12, %v429_v50, 0.0  ;;  %v363_v9 = vsel %vm1545_vm9, %v344_v63, 0.0  ;;  %v433_v23 = vsel %vm1563_vm13, %v428_v51, 0.0 }
 0x16c   :  { %v1520_v12 = vpop.permute.xlu0 %443  ;;  %v388_v19 = vadd.f32 %v377_v62, %v363_v9  ;;  %v436_v26 = vadd.f32 %v432_v52, %v415_v56  ;;  %v434_v35 = vsel %vm1545_vm9, %v427_v60, 0.0  ;;  %vm1713_vm5 = vcmp.lt.s32.totalorder %v330_v47, 240 }
 0x16d   :  { %v1530_v17 = vpop.permute.xlu1 %445  ;;  %v439_v37 = vadd.f32 %v435_v8, %v1459_v30  ;;  %v437_v30 = vadd.f32 %v433_v23, %v416_v28  ;;  %v2180_v45 = vsel %vm1713_vm5, 4294967295, %v2179_v45 }
 0x16e   :  { %v454_v16 = vsel %vm2174_vm8, %v1520_v12, %v1530_v17  ;;  %vm2176_vm8 = vcmp.lt.s32.totalorder %v1505_v0, 113  ;;  %v417_v40 = vadd.f32 %v413_v15, %v388_v19  ;;  %v440_v49 = vadd.f32 %v436_v26, %v1464_v32 }
 0x16f   :  { %v456_v41 = vsel %vm1534_vm7, %v454_v16, 0.0  ;;  %vm2177_vm14 = vmmov %vm2176_vm8 }
 0x170   :  { %v1554_v22 = vpop.permute.xlu0 %447  ;;  %v438_v48 = vadd.f32 %v434_v35, %v417_v40  ;;  %v460_v57 = vadd.f32 %v456_v41, %v439_v37 }
 0x171   :  { %v1574_v27 = vpop.permute.xlu1 %449  ;;  %v453_v1 = vsel %vm2175_vm6, %v1530_v17, %v1554_v22  ;;  %vm2140_vm6 = vmand %vm1630_vm2, %vm1559_vm12 }
 0x172   :  { %v457_v43 = vsel %vm1586_vm1, %v453_v1, 0.0 }
 0x173   :  { %v461_v54 = vadd.f32 %v457_v43, %v440_v49 }
 0x174   :  { %v1610_v42 = vpop.permute.xlu0 %464 }
 0x175   :  { %v467_v46 = vpop.permute.xlu1 %466 }
 0x176   :  { %v475_v38 = vsel %vm2176_vm8, %v1610_v42, %v467_v46  ;;  %vm2178_vm8 = vcmp.lt.s32.totalorder %v1505_v0, 127 }
 0x177   :  { %v452_v44 = vsel %vm2178_vm8, %v1554_v22, %v1574_v27  ;;  %vm2181_vm11 = vmmov %vm2178_vm8  ;;  %vm2182_vm8 = vcmp.lt.s32.totalorder %v1505_v0, 112 }
 0x178   :  { %v469_v7 = vpop.permute.xlu0 %468  ;;  %v455_v58 = vsel %vm2181_vm11, %v1574_v27, %v1520_v12  ;;  %v458_v61 = vsel %vm1582_vm0, %v452_v44, 0.0  ;;  %vm2183_vm10 = vmmov %vm2182_vm8  ;;  %v441_v27 = vadd.f32 %v437_v30, %v1461_v31 }
 0x179   :  { %v471_v10 = vpop.permute.xlu1 %470  ;;  %v474_v17 = vsel %vm2177_vm14, %v467_v46, %v469_v7  ;;  %v485_v46 = vsel %vm1526_vm4, %v475_v38, 0.0  ;;  %vm2138_vm11 = vmand %vm1713_vm5, %vm1545_vm9  ;;  %v459_v62 = vsel %vm1578_vm15, %v455_v58, 0.0 }
 0x17a   :  { %v486_v22 = vsel %vm2140_vm6, %v474_v17, 0.0  ;;  %v473_v63 = vsel %vm2177_vm14, %v469_v7, %v471_v10  ;;  %v489_v3 = vadd.f32 %v485_v46, %v460_v57  ;;  %v442_v7 = vadd.f32 %v438_v48, %v1466_v33 }
 0x17b   :  { %v490_v8 = vadd.f32 %v486_v22, %v461_v54  ;;  %v462_v51 = vadd.f32 %v458_v61, %v441_v27  ;;  %v487_v52 = vsel %vm1563_vm13, %v473_v63, 0.0  ;;  %v1329_v54 = vmov 0  }
 0x17c   :  { %v494_v5 = vpop.permute.xlu0 %493  ;;  %v463_v9 = vadd.f32 %v459_v62, %v442_v7  ;;  %1312 = vset.pattern.permute.xlu0 %v1329_v54  ;;  %1313 = vset.pattern.permute.xlu1 %v1329_v54  ;;  %v539_v7 = vld [vmem:[%s2121_s4] sm:$0xff] }
 0x17d   :  { %v498_v39 = vpop.permute.xlu1 %497  ;;  %v491_v16 = vadd.f32 %v487_v52, %v462_v51 }
 0x180   :  { %v496_v50 = vpop.permute.xlu0 %495 }
 0x181   :  { %v503_v32 = vsel %vm2182_vm8, %v496_v50, %v498_v39  ;;  %v515_v47 = vpop.permute.xlu1 %514  ;;  %v504_v12 = vsel %vm2183_vm10, %v494_v5, %v496_v50  ;;  %vm2184_vm8 = vmmov %vm2177_vm14  ;;  %vm2185_vm14 = vcmp.lt.s32.totalorder %v1505_v0, 111 }
 0x182   :  { %v476_v4 = vsel %vm2184_vm8, %v471_v10, %v1610_v42  ;;  %v507_v6 = vsel %vm1630_vm2, %v503_v32, 0.0  ;;  %vm2139_vm10 = vmand %vm1630_vm2, %vm1586_vm1  ;;  %v510_v42 = vadd.f32 %v504_v12, %v489_v3 }
 0x183   :  { %v488_v33 = vsel %vm2138_vm11, %v476_v4, 0.0  ;;  %v511_v55 = vadd.f32 %v507_v6, %v490_v8  ;;  %vm2186_vm8 = vmmov %vm2185_vm14  ;;  %vm2187_vm11 = vcmp.lt.s32.totalorder %v1505_v0, 112 }
 0x184   :  { %v517_v31 = vpop.permute.xlu0 %516  ;;  %v492_v26 = vadd.f32 %v488_v33, %v463_v9 }
 0x185   :  { %v525_v10 = vsel %vm2185_vm14, %v515_v47, %v517_v31  ;;  %v519_v59 = vpop.permute.xlu1 %518  ;;  %vm2142_vm14 = vmand %vm1713_vm5, %vm1578_vm15 }
 0x186   :  { %v531_v56 = vsel %vm1534_vm7, %v525_v10, 0.0  ;;  %v524_v60 = vsel %vm2186_vm8, %v517_v31, %v519_v59  ;;  %vm2188_vm8 = vmmov %vm2187_vm11  ;;  %v540_v31 = vld [vmem:[%s2122_s5] sm:$0xff] }
 0x187   :  { %v535_v11 = vadd.f32 %v531_v56, %v510_v42  ;;  %v532_v15 = vsel %vm2139_vm10, %v524_v60, 0.0  ;;  %vm2189_vm10 = vcmp.lt.s32.totalorder %v1505_v0, 111 }
 0x188   :  { %v536_v19 = vadd.f32 %v532_v15, %v511_v55  ;;  %v500_v23 = vpop.permute.xlu0 %499  ;;  %vm2190_vm6 = vmmov %vm2189_vm10 }
 0x189   :  { %v502_v1 = vsel %vm2187_vm11, %v498_v39, %v500_v23  ;;  %v505_v28 = vsel %vm2188_vm8, %v500_v23, %v494_v5  ;;  %v521_v35 = vpop.permute.xlu1 %520  ;;  %v546_v37 = vmul.f32 %v535_v11, %v535_v11  ;;  %vm2191_vm11 = vcmp.lt.s32.totalorder %v1505_v0, 16 }
 0x18a   :  { %v509_v38 = vsel %vm1713_vm5, %v505_v28, 0.0  ;;  %v512_v40 = vadd.f32 %v502_v1, %v491_v16  ;;  %v523_v41 = vsel %vm2189_vm10, %v519_v59, %v521_v35  ;;  %v526_v17 = vsel %vm2190_vm6, %v521_v35, %v515_v47  ;;  %v586_v35 = vld [vmem:[%s2123_s2] sm:$0xff] }
 0x18b   :  { %v513_v30 = vadd.f32 %v509_v38, %v492_v26  ;;  %v533_v43 = vsel %vm1582_vm0, %v523_v41, 0.0  ;;  %v534_v5 = vsel %vm2142_vm14, %v526_v17, 0.0  ;;  %v541_v44 = vadd.f32 %v536_v19, %v535_v11  ;;  %v590_v38 = vld [vmem:[%s2123_s2 + $0x20] sm:$0xff]  ;;  %v592_v41 = vld [vmem:[%s2123_s2 + $0x30] sm:$0xff]  ;;  %v593_v17 = vld [vmem:[%s2123_s2 + $0x38] sm:$0xff] }
 0x18c   :  { %v537_v39 = vadd.f32 %v533_v43, %v512_v40  ;;  %v547_v48 = vmul.f32 %v536_v19, %v536_v19  ;;  %vm2141_vm6 = vcmask 64512   ;;  %v591_v40 = vld [vmem:[%s2123_s2 + $0x28] sm:$0xff]  ;;  %vm2192_vm10 = vcmp.lt.s32.totalorder %v1505_v0, 17 }
 0x18d   :  { %v538_v49 = vadd.f32 %v534_v5, %v513_v30  ;;  %v594_v30 = vld [vmem:[%s2123_s2 + $0x40] sm:$0xff]  ;;  %vm2193_vm8 = vcmp.lt.s32.totalorder %v1505_v0, 15 }
 0x18e   :  { %v542_v46 = vadd.f32 %v541_v44, %v537_v39  ;;  %v548_v50 = vmul.f32 %v537_v39, %v537_v39  ;;  %v550_v57 = vadd.f32 %v547_v48, %v546_v37  ;;  %v589_v37 = vld [vmem:[%s2123_s2 + $0x18] sm:$0xff]  ;;  %vm2196_vm14 = vmmov %vm2193_vm8 }
 0x18f   :  { %v549_v58 = vmul.f32 %v538_v49, %v538_v49 }
 0x190   :  { %v543_v22 = vadd.f32 %v542_v46, %v538_v49  ;;  %v551_v32 = vadd.f32 %v550_v57, %v548_v50 }
 0x192   :  { %544 = vadd.xlane.f32.xlu0 %v543_v22  ;;  %v552_v47 = vadd.f32 %v551_v32, %v549_v58 }
 0x194   :  { %553 = vadd.xlane.f32.xlu1 %v552_v47 }
 0x21f   :  { %v545_v61 = vpop.xlane.xlu0 %544 }
 0x220   :  { %v555_v63 = vmul.f32 0.001953125, %v545_v61 }
 0x221   :  { %v554_v12 = vpop.xlane.xlu1 %553 }
 0x222   :  { %v557_v27 = vmul.f32 %v555_v63, %v555_v63  ;;  %v556_v3 = vmul.f32 0.001953125, %v554_v12 }
 0x224   :  { %v558_v4 = vsub.f32 %v556_v3, %v557_v27 }
 0x226   :  { %v559_v6 = vadd.f32 1e-05, %v558_v4 }
 0x228   :  { %1316 = vrsqrt.f32 %v559_v6 }
 0x232   :  { %v1317_v62 = vpop.eup %1316 }
 0x233   :  { %v561_v8 = vmul.f32 %v1317_v62, %v539_v7 }
 0x235   :  { %566 = vperm.xlu0 %1312, %v561_v8   ;;  %v562_v51 = vmul.f32 %v561_v8, %v555_v63 }
 0x237   :  { %v563_v52 = vsub.f32 %v540_v31, %v562_v51 }
 0x239   :  { %575 = vperm.xlu1 %1313, %v563_v52  }
 0x2b4   :  { %v567_v42 = vpop.permute.xlu0 %566 }
 0x2b5   :  { %v569_v10 = vmul.f32 %v567_v42, %v535_v11  ;;  %v570_v59 = vmul.f32 %v567_v42, %v536_v19  ;;  %v571_v33 = vmul.f32 %v567_v42, %v537_v39  ;;  %v572_v55 = vmul.f32 %v567_v42, %v538_v49  ;;  %v587_v11 = vld [vmem:[%s2123_s2 + $0x8] sm:$0xff]  ;;  %v588_v19 = vld [vmem:[%s2123_s2 + $0x10] sm:$0xff] }
 0x2b8   :  { %v576_v56 = vpop.permute.xlu1 %575 }
 0x2b9   :  { %v578_v60 = vadd.f32 %v576_v56, %v569_v10  ;;  %v580_v9 = vadd.f32 %v576_v56, %v571_v33  ;;  %v579_v15 = vadd.f32 %v576_v56, %v570_v59  ;;  %v581_v16 = vadd.f32 %v576_v56, %v572_v55 }
 0x2bb   :  { %v582_v23 = vmax.f32 %v578_v60, 0.0  ;;  %v584_v26 = vmax.f32 %v580_v9, 0.0  ;;  %v583_v1 = vmax.f32 %v579_v15, 0.0  ;;  %v585_v28 = vmax.f32 %v581_v16, 0.0 }
 0x2bd   :  { %623 = vmatprep.subr.mxu0 %v583_v1  ;;  %742 = vmatprep.subr.mxu1 %v585_v28 }
 0x2be   :  { %624 = vmatpush1.msra.mxu0 %v582_v23  ;;  %743 = vmatpush1.msra.mxu1 %v584_v26 }
 0x2bf   :  { %1280 = vmatmul.mubr.msk.f32.vlgmr.msra.gmra.mrb[18].mxu0 %vm2141_vm6, %v586_v35  ;;  %1289 = vmatmul.mubr.msk.f32.vlgmr.msra.gmra.mrb[18].mxu1 %vm2141_vm6, %v586_v35 }
 0x2c0   :  { %693 = vmatprep.mubr.f32.mxu0 %v1320_v2  ;;  %812 = vmatprep.mubr.f32.mxu1 %v1320_v2 }
 0x2c3   :  { %1281 = vmatmul.mubr.msk.f32.gmra.mrb[20].mxu0 %vm2141_vm6, %v587_v11  ;;  %1290 = vmatmul.mubr.msk.f32.gmra.mrb[20].mxu1 %vm2141_vm6, %v587_v11 }
 0x2c4   :  { %699 = vmatprep.mubr.f32.mxu0 %v1320_v2  ;;  %818 = vmatprep.mubr.f32.mxu1 %v1320_v2 }
 0x2c7   :  { %1282 = vmatmul.mubr.msk.f32.gmra.mrb[22].mxu0 %vm2141_vm6, %v588_v19  ;;  %1291 = vmatmul.mubr.msk.f32.gmra.mrb[22].mxu1 %vm2141_vm6, %v588_v19 }
 0x2c8   :  { %705 = vmatprep.mubr.f32.mxu0 %v1320_v2  ;;  %824 = vmatprep.mubr.f32.mxu1 %v1320_v2 }
 0x2cb   :  { %1283 = vmatmul.mubr.msk.f32.gmra.mrb[24].mxu0 %vm2141_vm6, %v589_v37  ;;  %1292 = vmatmul.mubr.msk.f32.gmra.mrb[24].mxu1 %vm2141_vm6, %v589_v37 }
 0x2cc   :  { %711 = vmatprep.mubr.f32.mxu0 %v1320_v2  ;;  %830 = vmatprep.mubr.f32.mxu1 %v1320_v2 }
 0x2cf   :  { %1284 = vmatmul.mubr.msk.f32.gmra.mrb[26].mxu0 %vm2141_vm6, %v590_v38  ;;  %1293 = vmatmul.mubr.msk.f32.gmra.mrb[26].mxu1 %vm2141_vm6, %v590_v38 }
 0x2d0   :  { %717 = vmatprep.mubr.f32.mxu0 %v1320_v2  ;;  %836 = vmatprep.mubr.f32.mxu1 %v1320_v2 }
 0x2d3   :  { %1285 = vmatmul.mubr.msk.f32.gmra.mrb[28].mxu0 %vm2141_vm6, %v591_v40  ;;  %1294 = vmatmul.mubr.msk.f32.gmra.mrb[28].mxu1 %vm2141_vm6, %v591_v40 }
 0x2d4   :  { %723 = vmatprep.mubr.f32.mxu0 %v1320_v2  ;;  %842 = vmatprep.mubr.f32.mxu1 %v1320_v2 }
 0x2d7   :  { %1286 = vmatmul.mubr.msk.f32.gmra.mrb[30].mxu0 %vm2141_vm6, %v592_v41  ;;  %1295 = vmatmul.mubr.msk.f32.gmra.mrb[30].mxu1 %vm2141_vm6, %v592_v41 }
 0x2d8   :  { %729 = vmatprep.mubr.f32.mxu0 %v1320_v2  ;;  %848 = vmatprep.mubr.f32.mxu1 %v1320_v2 }
 0x2db   :  { %1287 = vmatmul.mubr.msk.f32.gmra.mrb[32].mxu0 %vm2141_vm6, %v593_v17  ;;  %1296 = vmatmul.mubr.msk.f32.gmra.mrb[32].mxu1 %vm2141_vm6, %v593_v17 }
 0x2dc   :  { %735 = vmatprep.mubr.f32.mxu0 %v1320_v2  ;;  %854 = vmatprep.mubr.f32.mxu1 %v1320_v2 }
 0x2df   :  { %1288 = vmatmul.mubr.msk.f32.gmra.mrb[34].mxu0 %vm2141_vm6, %v594_v30  ;;  %1297 = vmatmul.mubr.msk.f32.gmra.mrb[34].mxu1 %vm2141_vm6, %v594_v30  ;;  %vm2194_vm6 = vmmov %vm2192_vm10 }
 0x2e0   :  { %1156 = vmatprep.mubr.f32.mxu0 %v1320_v2  ;;  %1233 = vmatprep.mubr.f32.mxu1 %v1320_v2  ;;  %vm2198_vm5 = vmmov %vm2194_vm6 }
 0x392   :  { %v689_v43 = vpop.f32.mrb[18].mxu0  ;;  %v808_v5 = vpop.f32.mrb[18].mxu1 }
 0x393   :  { %861 = vrot.lane.b32.xlu1 %v689_v43, %s1321_s30  ;;  %v691_v39 = vpop.f32.mrb[19].mxu0  ;;  %865 = vrot.lane.b32.xlu0 %v808_v5, %s1321_s30  ;;  %v810_v44 = vpop.f32.mrb[19].mxu1 }
 0x396   :  { %v695_v48 = vpop.f32.mrb[20].mxu0  ;;  %v814_v49 = vpop.f32.mrb[20].mxu1 }
 0x397   :  { %863 = vrot.lane.b32.xlu1 %v691_v39, %s1321_s30  ;;  %v697_v46 = vpop.f32.mrb[21].mxu0  ;;  %v816_v50 = vpop.f32.mrb[21].mxu1 }
 0x39a   :  { %v701_v57 = vpop.f32.mrb[22].mxu0  ;;  %v820_v58 = vpop.f32.mrb[22].mxu1 }
 0x39b   :  { %867 = vrot.lane.b32.xlu1 %v810_v44, %s1321_s30  ;;  %901 = vrot.lane.b32.xlu0 %v701_v57, %s1323_s10  ;;  %v822_v22 = vpop.f32.mrb[23].mxu1  ;;  %v703_v32 = vpop.f32.mrb[23].mxu0 }
 0x39e   :  { %v707_v47 = vpop.f32.mrb[24].mxu0  ;;  %v826_v54 = vpop.f32.mrb[24].mxu1 }
 0x39f   :  { %881 = vrot.lane.b32.xlu1 %v695_v48, %s1322_s1  ;;  %907 = vrot.lane.b32.xlu0 %v822_v22, %s1323_s10  ;;  %v828_v61 = vpop.f32.mrb[25].mxu1  ;;  %v709_v63 = vpop.f32.mrb[25].mxu0 }
 0x3a2   :  { %v1870_v12 = vpop.f32.mrb[26].mxu0  ;;  %v1872_v27 = vpop.f32.mrb[26].mxu1 }
 0x3a3   :  { %885 = vrot.lane.b32.xlu1 %v814_v49, %s1322_s1  ;;  %921 = vrot.lane.b32.xlu0 %v707_v47, %s1324_s11  ;;  %v1876_v3 = vpop.f32.mrb[27].mxu0  ;;  %v1878_v4 = vpop.f32.mrb[27].mxu1 }
 0x3a6   :  { %v719_v6 = vpop.f32.mrb[28].mxu0  ;;  %v838_v7 = vpop.f32.mrb[28].mxu1 }
 0x3a7   :  { %887 = vrot.lane.b32.xlu1 %v816_v50, %s1322_s1  ;;  %927 = vrot.lane.b32.xlu0 %v828_v61, %s1324_s11  ;;  %v721_v62 = vpop.f32.mrb[29].mxu0  ;;  %v840_v8 = vpop.f32.mrb[29].mxu1 }
 0x3aa   :  { %v725_v31 = vpop.f32.mrb[30].mxu0  ;;  %v844_v51 = vpop.f32.mrb[30].mxu1 }
 0x3ab   :  { %883 = vrot.lane.b32.xlu1 %v697_v46, %s1322_s1  ;;  %945 = vrot.lane.b32.xlu0 %v719_v6, %s1325_s12  ;;  %v727_v52 = vpop.f32.mrb[31].mxu0  ;;  %v846_v42 = vpop.f32.mrb[31].mxu1 }
 0x3ae   :  { %v731_v10 = vpop.f32.mrb[32].mxu0  ;;  %v850_v59 = vpop.f32.mrb[32].mxu1 }
 0x3af   :  { %905 = vrot.lane.b32.xlu1 %v820_v58, %s1323_s10  ;;  %949 = vrot.lane.b32.xlu0 %v838_v7, %s1325_s12  ;;  %v733_v33 = vpop.f32.mrb[33].mxu0  ;;  %v852_v55 = vpop.f32.mrb[33].mxu1 }
 0x3b2   :  { %v737_v56 = vpop.f32.mrb[34].mxu0  ;;  %v856_v60 = vpop.f32.mrb[34].mxu1 }
 0x3b3   :  { %903 = vrot.lane.b32.xlu1 %v703_v32, %s1323_s10  ;;  %965 = vrot.lane.b32.xlu0 %v725_v31, %s1326_s13  ;;  %v739_v9 = vpop.f32.mrb[35].mxu0  ;;  %v858_v15 = vpop.f32.mrb[35].mxu1 }
 0x3b7   :  { %925 = vrot.lane.b32.xlu1 %v826_v54, %s1324_s11  ;;  %969 = vrot.lane.b32.xlu0 %v844_v51, %s1326_s13 }
 0x3bb   :  { %923 = vrot.lane.b32.xlu1 %v709_v63, %s1324_s11  ;;  %985 = vrot.lane.b32.xlu0 %v731_v10, %s1327_s14 }
 0x3bf   :  { %947 = vrot.lane.b32.xlu1 %v721_v62, %s1325_s12  ;;  %987 = vrot.lane.b32.xlu0 %v733_v33, %s1327_s14 }
 0x3c3   :  { %951 = vrot.lane.b32.xlu1 %v840_v8, %s1325_s12  ;;  %1007 = vrot.lane.b32.xlu0 %v739_v9, %s1328_s0 }
 0x3c7   :  { %967 = vrot.lane.b32.xlu1 %v727_v52, %s1326_s13  ;;  %991 = vrot.lane.b32.xlu0 %v852_v55, %s1327_s14 }
 0x3cb   :  { %971 = vrot.lane.b32.xlu1 %v846_v42, %s1326_s13 }
 0x3cf   :  { %989 = vrot.lane.b32.xlu1 %v850_v59, %s1327_s14 }
 0x3d3   :  { %1005 = vrot.lane.b32.xlu1 %v737_v56, %s1328_s0 }
 0x3d7   :  { %1009 = vrot.lane.b32.xlu1 %v856_v60, %s1328_s0 }
 0x3db   :  { %1011 = vrot.lane.b32.xlu1 %v858_v15, %s1328_s0 }
 0x405   :  { %v862_v16 = vpop.permute.xlu1 %861  ;;  %v866_v23 = vpop.permute.xlu0 %865 }
 0x409   :  { %v864_v26 = vpop.permute.xlu1 %863 }
 0x40a   :  { %v871_v47 = vsel %vm2194_vm6, %v862_v16, %v864_v26 }
 0x40b   :  { %v874_v59 = vsel %vm1559_vm12, %v871_v47, 0.0 }
 0x40d   :  { %v868_v1 = vpop.permute.xlu1 %867  ;;  %v902_v28 = vpop.permute.xlu0 %901 }
 0x40e   :  { %v872_v58 = vsel %vm2192_vm10, %v868_v1, %v862_v16  ;;  %vm2197_vm10 = vmmov %vm2194_vm6  ;;  %v869_v7 = vsel %vm2198_vm5, %v866_v23, %v868_v1 }
 0x40f   :  { %v870_v6 = vsel %vm2197_vm10, %v864_v26, %v866_v23  ;;  %vm2200_vm6 = vmand %vm1522_vm3, %vm1534_vm7  ;;  %vm2202_vm10 = vcmp.lt.s32.totalorder %v1505_v0, 1  ;;  %v876_v56 = vsel %vm1545_vm9, %v869_v7, 0.0 }
 0x411   :  { %v882_v35 = vpop.permute.xlu1 %881  ;;  %v908_v11 = vpop.permute.xlu0 %907 }
 0x412   :  { %v912_v32 = vsel %vm2193_vm8, %v908_v11, %v902_v28  ;;  %vm2199_vm8 = vcmp.lt.s32.totalorder %v1505_v0, 16 }
 0x413   :  { %v913_v31 = vsel %vm2200_vm6, %v912_v32, 0.0  ;;  %vm2203_vm5 = vmmov %vm2199_vm8 }
 0x415   :  { %v886_v19 = vpop.permute.xlu1 %885  ;;  %v922_v37 = vpop.permute.xlu0 %921 }
 0x419   :  { %v888_v38 = vpop.permute.xlu1 %887  ;;  %v928_v40 = vpop.permute.xlu0 %927 }
 0x41a   :  { %v892_v46 = vsel %vm2191_vm11, %v888_v38, %v882_v35  ;;  %vm2195_vm11 = vmand %vm1522_vm3, %vm1526_vm4  ;;  %v889_v13 = vsel %vm2203_vm5, %v886_v19, %v888_v38 }
 0x41b   :  { %v893_v22 = vsel %vm1522_vm3, %v892_v46, 0.0  ;;  %v873_v54 = vsel %vm2195_vm11, %v872_v58, 0.0  ;;  %vm2201_vm11 = vmmov %vm2199_vm8 }
 0x41c   :  { %v897_v62 = vadd.f32 %v893_v22, %v873_v54  ;;  %vm2205_vm3 = vmmov %vm2196_vm14 }
 0x41d   :  { %v884_v41 = vpop.permute.xlu1 %883  ;;  %v1903_v17 = vpop.permute.xlu0 %945 }
 0x41e   :  { %v891_v8 = vsel %vm2199_vm8, %v882_v35, %v884_v41  ;;  %v890_v51 = vsel %vm2201_vm11, %v884_v41, %v886_v19  ;;  %vm2204_vm8 = vmmov %vm2202_vm10  ;;  %vm2207_vm11 = vnez %v2154_v21  ;;  %v917_v26 = vadd.f32 %v913_v31, %v897_v62 }
 0x41f   :  { %v932_v33 = vsel %vm2204_vm8, %v928_v40, %v922_v37  ;;  %v898_v60 = vadd.f32 %v891_v8, %v874_v59  ;;  %vm2206_vm6 = vmmov %vm2204_vm8  ;;  %v895_v23 = vsel %vm2207_vm11, %v890_v51, 0.0  ;;  %v900_v35 = vadd.f32 %v889_v13, %v876_v56 }
 0x420   :  { %vm2210_vm5 = vmand %vm2207_vm11, %vm1582_vm0  ;;  %vm2211_vm8 = vcmp.lt.s32.totalorder %v1505_v0, 127 }
 0x421   :  { %v906_v30 = vpop.permute.xlu1 %905  ;;  %v1905_v43 = vpop.permute.xlu0 %949 }
 0x422   :  { %v909_v52 = vsel %vm2196_vm14, %v906_v30, %v908_v11  ;;  %v933_v11 = vsel %vm1526_vm4, %v932_v33, 0.0 }
 0x423   :  { %v916_v1 = vsel %vm1578_vm15, %v909_v52, 0.0 }
 0x425   :  { %v904_v5 = vpop.permute.xlu1 %903  ;;  %v1907_v39 = vpop.permute.xlu0 %965 }
 0x426   :  { %v911_v61 = vsel %vm2196_vm14, %v902_v28, %v904_v5  ;;  %v910_v9 = vsel %vm2205_vm3, %v904_v5, %v906_v30  ;;  %vm2208_vm14 = vmmov %vm2206_vm6  ;;  %v920_v5 = vadd.f32 %v916_v1, %v900_v35 }
 0x427   :  { %v914_v55 = vsel %vm1586_vm1, %v911_v61, 0.0  ;;  %vm2212_vm3 = vmmov %vm2211_vm8 }
 0x428   :  { %v918_v19 = vadd.f32 %v914_v55, %v898_v60 }
 0x429   :  { %v926_v44 = vpop.permute.xlu1 %925  ;;  %v1909_v48 = vpop.permute.xlu0 %969 }
 0x42a   :  { %v929_v15 = vsel %vm2206_vm6, %v926_v44, %v928_v40  ;;  %v915_v40 = vsel %vm2210_vm5, %v910_v9, 0.0  ;;  %vm2213_vm6 = vcmp.lt.s32.totalorder %v1505_v0, 113 }
 0x42b   :  { %v936_v41 = vsel %vm1545_vm9, %v929_v15, 0.0  ;;  %vm2217_vm5 = vmmov %vm2213_vm6 }
 0x42c   :  { %v940_v47 = vadd.f32 %v936_v41, %v920_v5 }
 0x42d   :  { %v924_v49 = vpop.permute.xlu1 %923  ;;  %v1913_v57 = vpop.permute.xlu0 %985 }
 0x42e   :  { %v931_v42 = vsel %vm2202_vm10, %v922_v37, %v924_v49  ;;  %v930_v37 = vsel %vm2208_vm14, %v924_v49, %v926_v44  ;;  %vm2209_vm10 = vmand %vm2207_vm11, %vm1563_vm13  ;;  %v937_v49 = vadd.f32 %v933_v11, %v917_v26 }
 0x42f   :  { %v934_v28 = vsel %vm1559_vm12, %v931_v42, 0.0  ;;  %v875_v38 = vsel %vm2209_vm10, %v870_v6, 0.0  ;;  %v935_v22 = vsel %vm1563_vm13, %v930_v37, 0.0  ;;  %vm2214_vm11 = vmmov %vm2212_vm3  ;;  %v944_v42 = vadd.f32 %v940_v47, %v1878_v4 }
 0x430   :  { %v899_v30 = vadd.f32 %v895_v23, %v875_v38  ;;  %v938_v46 = vadd.f32 %v934_v28, %v918_v19  ;;  %v941_v51 = vadd.f32 %v937_v49, %v1870_v12  ;;  %vm2215_vm14 = vmmov %vm2212_vm3 }
 0x431   :  { %v948_v50 = vpop.permute.xlu1 %947  ;;  %v988_v10 = vpop.permute.xlu0 %987  ;;  %vm2216_vm10 = vmmov %vm2213_vm6 }
 0x432   :  { %v955_v21 = vsel %vm2211_vm8, %v1903_v17, %v948_v50  ;;  %v919_v32 = vadd.f32 %v915_v40, %v899_v30  ;;  %v954_v54 = vsel %vm2212_vm3, %v948_v50, %v1905_v43  ;;  %v942_v7 = vadd.f32 %v938_v46, %v1876_v3  ;;  %vm2218_vm8 = vmmov %vm2217_vm5 }
 0x433   :  { %v957_v62 = vsel %vm1534_vm7, %v955_v21, 0.0  ;;  %v958_v50 = vsel %vm1586_vm1, %v954_v54, 0.0  ;;  %vm2219_vm3 = vcmp.lt.s32.totalorder %v1505_v0, 112 }
 0x434   :  { %v939_v6 = vadd.f32 %v935_v22, %v919_v32  ;;  %v961_v13 = vadd.f32 %v957_v62, %v941_v51  ;;  %v962_v4 = vadd.f32 %v958_v50, %v942_v7 }
 0x435   :  { %v952_v63 = vpop.permute.xlu1 %951  ;;  %v1008_v58 = vpop.permute.xlu0 %1007 }
 0x436   :  { %v956_v8 = vsel %vm2214_vm11, %v952_v63, %v1903_v17  ;;  %v953_v52 = vsel %vm2215_vm14, %v1905_v43, %v952_v63  ;;  %v943_v14 = vadd.f32 %v939_v6, %v1872_v27  ;;  %vm2223_vm14 = vmmov %vm2219_vm3 }
 0x437   :  { %v960_v33 = vsel %vm1578_vm15, %v956_v8, 0.0  ;;  %v959_v55 = vsel %vm1582_vm0, %v953_v52, 0.0  ;;  %v1025_v52 = vld [vmem:[%s2124_s6] sm:$0xff] }
 0x438   :  { %v964_v15 = vadd.f32 %v960_v33, %v944_v42  ;;  %v963_v23 = vadd.f32 %v959_v55, %v943_v14  ;;  %v1075_v33 = vld [vmem:[%s2126_s8 + $0x8] sm:$0xff] }
 0x439   :  { %v968_v16 = vpop.permute.xlu1 %967  ;;  %v992_v17 = vpop.permute.xlu0 %991 }
 0x43a   :  { %v975_v61 = vsel %vm2213_vm6, %v1907_v39, %v968_v16  ;;  %v974_v3 = vsel %vm2216_vm10, %v968_v16, %v1909_v48  ;;  %vm2221_vm6 = vnez %v2180_v45  ;;  %v996_v27 = vsel %vm2223_vm14, %v992_v17, %v1913_v57 }
 0x43b   :  { %v977_v59 = vsel %vm1526_vm4, %v975_v61, 0.0  ;;  %vm2220_vm4 = vmand %vm1630_vm2, %vm1559_vm12  ;;  %vm2224_vm10 = vcmp.lt.s32.totalorder %v1505_v0, 111  ;;  %v1000_v28 = vsel %vm2221_vm6, %v996_v27, 0.0 }
 0x43c   :  { %v981_v60 = vadd.f32 %v977_v59, %v961_v13  ;;  %vm2222_vm11 = vmand %vm2221_vm6, %vm1545_vm9  ;;  %v1026_v59 = vld [vmem:[%s2125_s7] sm:$0xff] }
 0x43d   :  { %v972_v44 = vpop.permute.xlu1 %971  ;;  %vm2225_vm12 = vmmov %vm2219_vm3 }
 0x43e   :  { %v976_v12 = vsel %vm2217_vm5, %v972_v44, %v1907_v39  ;;  %v973_v43 = vsel %vm2218_vm8, %v1909_v48, %v972_v44  ;;  %v978_v39 = vsel %vm2220_vm4, %v974_v3, 0.0  ;;  %v995_v24 = vsel %vm2225_vm12, %v1913_v57, %v988_v10  ;;  %vm2226_vm9 = vmmov %vm2224_vm10 }
 0x43f   :  { %v980_v48 = vsel %vm2222_vm11, %v976_v12, 0.0  ;;  %v979_v16 = vsel %vm1563_vm13, %v973_v43, 0.0  ;;  %v982_v26 = vadd.f32 %v978_v39, %v962_v4  ;;  %v1001_v38 = vadd.f32 %v995_v24, %v981_v60  ;;  %vm2227_vm13 = vmmov %vm2219_vm3 }
 0x440   :  { %v984_v1 = vadd.f32 %v980_v48, %v964_v15  ;;  %v983_v19 = vadd.f32 %v979_v16, %v963_v23  ;;  %vm2228_vm5 = vmand %vm1630_vm2, %vm1586_vm1  ;;  %v1073_v23 = vld [vmem:[%s2127_s3 + $0x8] sm:$0xff] }
 0x441   :  { %v990_v31 = vpop.permute.xlu1 %989  ;;  %vm2231_vm1 = vmand %vm2221_vm6, %vm1578_vm15  ;;  %vm2232_vm15 = vcmask 64512  }
 0x442   :  { %v994_v63 = vsel %vm2219_vm3, %v988_v10, %v990_v31  ;;  %v993_v57 = vsel %vm2227_vm13, %v990_v31, %v992_v17  ;;  %v1004_v18 = vadd.f32 %v1000_v28, %v984_v1  ;;  %v1074_v17 = vld [vmem:[%s2126_s8] sm:$0xff] }
 0x443   :  { %v998_v20 = vsel %vm1630_vm2, %v994_v63, 0.0  ;;  %v1003_v5 = vadd.f32 %v993_v57, %v983_v19 }
 0x444   :  { %v1002_v37 = vadd.f32 %v998_v20, %v982_v26  ;;  %v1072_v20 = vld [vmem:[%s2127_s3] sm:$0xff] }
 0x445   :  { %v1006_v56 = vpop.permute.xlu1 %1005 }
 0x446   :  { %v1015_v9 = vsel %vm2224_vm10, %v1006_v56, %v1008_v58 }
 0x447   :  { %v1017_v35 = vsel %vm1534_vm7, %v1015_v9, 0.0  ;;  %vm2229_vm7 = vmmov %vm2226_vm9 }
 0x448   :  { %v1021_v40 = vadd.f32 %v1017_v35, %v1001_v38  ;;  %vm2230_vm8 = vmmov %vm2229_vm7 }
 0x449   :  { %v1010_v11 = vpop.permute.xlu1 %1009 }
 0x44a   :  { %v1014_v25 = vsel %vm2226_vm9, %v1008_v58, %v1010_v11  ;;  %v1032_v32 = vmul.f32 %v1021_v40, %v1021_v40 }
 0x44b   :  { %v1018_v10 = vsel %vm2228_vm5, %v1014_v25, 0.0 }
 0x44c   :  { %v1022_v41 = vadd.f32 %v1018_v10, %v1002_v37 }
 0x44d   :  { %v1012_v30 = vpop.permute.xlu1 %1011 }
 0x44e   :  { %v1013_v46 = vsel %vm2229_vm7, %v1010_v11, %v1012_v30  ;;  %v1016_v58 = vsel %vm2230_vm8, %v1012_v30, %v1006_v56  ;;  %v1033_v44 = vmul.f32 %v1022_v41, %v1022_v41  ;;  %v1027_v21 = vadd.f32 %v1022_v41, %v1021_v40 }
 0x44f   :  { %v1019_v49 = vsel %vm1582_vm0, %v1013_v46, 0.0  ;;  %v1020_v36 = vsel %vm2231_vm1, %v1016_v58, 0.0  ;;  %vm2233_vm0 = vmmov %vm2232_vm15 }
 0x450   :  { %v1023_v53 = vadd.f32 %v1019_v49, %v1003_v5  ;;  %v1024_v22 = vadd.f32 %v1020_v36, %v1004_v18  ;;  %v1036_v61 = vadd.f32 %v1033_v44, %v1032_v32  ;;  %vm2234_vm2 = vmmov %vm2233_vm0 }
 0x451   :  { %vm2235_vm3 = vmmov %vm2233_vm0 }
 0x452   :  { %v1028_v47 = vadd.f32 %v1027_v21, %v1023_v53  ;;  %v1034_v54 = vmul.f32 %v1023_v53, %v1023_v53  ;;  %v1035_v0 = vmul.f32 %v1024_v22, %v1024_v22 }
 0x454   :  { %v1029_v6 = vadd.f32 %v1028_v47, %v1024_v22  ;;  %v1037_v7 = vadd.f32 %v1036_v61, %v1034_v54 }
 0x456   :  { %1030 = vadd.xlane.f32.xlu0 %v1029_v6  ;;  %v1038_v62 = vadd.f32 %v1037_v7, %v1035_v0 }
 0x458   :  { %1039 = vadd.xlane.f32.xlu1 %v1038_v62 }
 0x4e3   :  { %v1031_v34 = vpop.xlane.xlu0 %1030 }
 0x4e4   :  { %v1041_v8 = vmul.f32 0.001953125, %v1031_v34 }
 0x4e5   :  { %v1040_v45 = vpop.xlane.xlu1 %1039 }
 0x4e6   :  { %v1043_v31 = vmul.f32 %v1041_v8, %v1041_v8  ;;  %v1042_v29 = vmul.f32 0.001953125, %v1040_v45 }
 0x4e8   :  { %v1044_v51 = vsub.f32 %v1042_v29, %v1043_v31 }
 0x4ea   :  { %v1045_v50 = vadd.f32 1e-05, %v1044_v51 }
 0x4ec   :  { %1318 = vrsqrt.f32 %v1045_v50 }
 0x4f6   :  { %v1319_v3 = vpop.eup %1318 }
 0x4f7   :  { %v1047_v42 = vmul.f32 %v1319_v3, %v1025_v52 }
 0x4f9   :  { %1052 = vperm.xlu0 %1312, %v1047_v42   ;;  %v1048_v12 = vmul.f32 %v1047_v42, %v1041_v8 }
 0x4fb   :  { %v1049_v13 = vsub.f32 %v1026_v59, %v1048_v12 }
 0x4fd   :  { %1078 = vperm.xlu0 %1312, %v1074_v17   ;;  %1061 = vperm.xlu1 %1313, %v1049_v13  }
 0x501   :  { %1083 = vperm.xlu1 %1313, %v1075_v33  }
 0x578   :  { %v1053_v43 = vpop.permute.xlu0 %1052 }
 0x579   :  { %v1055_v63 = vmul.f32 %v1053_v43, %v1021_v40  ;;  %v1056_v4 = vmul.f32 %v1053_v43, %v1022_v41  ;;  %v1057_v14 = vmul.f32 %v1053_v43, %v1023_v53  ;;  %v1058_v55 = vmul.f32 %v1053_v43, %v1024_v22 }
 0x57c   :  { %v1062_v39 = vpop.permute.xlu1 %1061  ;;  %v1079_v26 = vpop.permute.xlu0 %1078 }
 0x57d   :  { %v1064_v56 = vadd.f32 %v1062_v39, %v1055_v63  ;;  %v1066_v60 = vadd.f32 %v1062_v39, %v1057_v14  ;;  %v1065_v48 = vadd.f32 %v1062_v39, %v1056_v4  ;;  %v1067_v27 = vadd.f32 %v1062_v39, %v1058_v55 }
 0x57f   :  { %v1068_v9 = vmax.f32 %v1064_v56, 0.0  ;;  %v1070_v15 = vmax.f32 %v1066_v60, 0.0  ;;  %v1069_v24 = vmax.f32 %v1065_v48, 0.0  ;;  %v1071_v16 = vmax.f32 %v1067_v27, 0.0 }
 0x580   :  { %v1084_v57 = vpop.permute.xlu1 %1083 }
 0x581   :  { %1092 = vmatprep.subr.mxu0 %v1069_v24  ;;  %1169 = vmatprep.subr.mxu1 %v1071_v16 }
 0x582   :  { %1093 = vmatpush1.msra.mxu0 %v1068_v9  ;;  %1170 = vmatpush1.msra.mxu1 %v1070_v15 }
 0x583   :  { %1298 = vmatmul.mubr.msk.f32.vlgmr.msra.gmra.mrb[36].mxu0 %vm2232_vm15, %v1072_v20  ;;  %1300 = vmatmul.mubr.msk.f32.vlgmr.msra.gmra.mrb[36].mxu1 %vm2233_vm0, %v1072_v20 }
 0x584   :  { %1162 = vmatprep.mubr.f32.mxu0 %v1320_v2  ;;  %1239 = vmatprep.mubr.f32.mxu1 %v1320_v2 }
 0x587   :  { %1299 = vmatmul.mubr.msk.f32.gmra.mrb[38].mxu0 %vm2234_vm2, %v1073_v23  ;;  %1301 = vmatmul.mubr.msk.f32.gmra.mrb[38].mxu1 %vm2235_vm3, %v1073_v23 }
 0x656   :  { %v1158_v1 = vpop.f32.mrb[36].mxu0  ;;  %v1235_v28 = vpop.f32.mrb[36].mxu1 }
 0x657   :  { %v1159_v35 = vadd.f32 %v1158_v1, %v1079_v26  ;;  %v1236_v11 = vadd.f32 %v1235_v28, %v1079_v26  ;;  %v1160_v19 = vpop.f32.mrb[37].mxu0  ;;  %v1237_v37 = vpop.f32.mrb[37].mxu1 }
 0x658   :  { %v1161_v38 = vadd.f32 %v1160_v19, %v1079_v26  ;;  %v1238_v25 = vadd.f32 %v1237_v37, %v1079_v26 }
 0x659   :  { %1246 = vst [vmem:[%s2128_s9] sm:$0xff] %v1159_v35  ;;  %1248 = vst [vmem:[%s2128_s9 + $0x10] sm:$0xff] %v1236_v11 }
 0x65a   :  { %1247 = vst [vmem:[%s2128_s9 + $0x8] sm:$0xff] %v1161_v38  ;;  %1249 = vst [vmem:[%s2128_s9 + $0x18] sm:$0xff] %v1238_v25  ;;  %v1164_v2 = vpop.f32.mrb[38].mxu0  ;;  %v1241_v10 = vpop.f32.mrb[38].mxu1 }
 0x65b   :  { %v1165_v40 = vadd.f32 %v1164_v2, %v1084_v57  ;;  %v1242_v41 = vadd.f32 %v1241_v10, %v1084_v57  ;;  %v1166_v18 = vpop.f32.mrb[39].mxu0  ;;  %v1243_v30 = vpop.f32.mrb[39].mxu1 }
 0x65c   :  { %v1167_v5 = vadd.f32 %v1166_v18, %v1084_v57  ;;  %v1244_v46 = vadd.f32 %v1243_v30, %v1084_v57 }
 0x65d   :  { %1250 = vst [vmem:[%s2128_s9 + $0x20] sm:$0xff] %v1165_v40  ;;  %1252 = vst [vmem:[%s2128_s9 + $0x30] sm:$0xff] %v1242_v41 }
 0x65e   :  { %1251 = vst [vmem:[%s2128_s9 + $0x28] sm:$0xff] %v1167_v5  ;;  %1253 = vst [vmem:[%s2128_s9 + $0x38] sm:$0xff] %v1244_v46 }

</bundles_post_ra>
